<compile_context>
chip_gen: v7x
topology: tpu7x:2x2x1
jax: 0.10.0
libtpu: 0.0.40
codegen_flags: <defaults>
</compile_context>

<pallas_src>
import functools

import jax
import jax.numpy as jnp
from jax.experimental import pallas as pl
from jax.experimental.pallas import tpu as pltpu

DIM = 512
IN_PAD = 128    # pad the 3-wide concatenated input to a lane-dense 128-wide slab
OUT_PAD = 128   # pad the 2-wide output to a lane-dense 128-wide slab
MAX_TILE_B = 512  # sized for v7x's 64 MiB VMEM (f32 intermediates ~1 MiB/layer)


def _round_up(x, m):
    return ((x + m - 1) // m) * m


def _softplus(x):
    # PyTorch Softplus(beta=1, threshold=20): x if x > 20 else log1p(exp(x)).
    # The discarded branch can only produce +inf (never NaN), so no extra clamp.
    return jnp.where(x > 20.0, x, jnp.log1p(jnp.exp(x)))


def mlp_kernel(x_ref, w1_ref, b1_ref, w2_ref, b2_ref, w3_ref, b3_ref,
               w4_ref, b4_ref, o_ref):
    # All matmuls: bf16 operands on the MXU, f32 accumulation.
    # Layer 1: (TB, 128) @ (128, 512)
    h = jnp.dot(x_ref[...], w1_ref[...], preferred_element_type=jnp.float32)
    h = _softplus(h + b1_ref[...]).astype(jnp.bfloat16)
    # Layer 2: (TB, 512) @ (512, 512)
    h = jnp.dot(h, w2_ref[...], preferred_element_type=jnp.float32)
    h = _softplus(h + b2_ref[...]).astype(jnp.bfloat16)
    # Layer 3: (TB, 512) @ (512, 512)
    h = jnp.dot(h, w3_ref[...], preferred_element_type=jnp.float32)
    h = _softplus(h + b3_ref[...]).astype(jnp.bfloat16)
    # Layer 4 (output, zero-padded to 128 lanes): (TB, 512) @ (512, 128)
    out = jnp.dot(h, w4_ref[...], preferred_element_type=jnp.float32) + b4_ref[...]
    o_ref[...] = out.astype(o_ref.dtype)


@functools.partial(jax.jit, static_argnames=("tile_b",))
def generator_forward(params, x_t, t, *, tile_b=MAX_TILE_B):
    """params: dict of weights; x_t: (B, 2) f32; t: (B,) f32 -> (B, 2) f32."""
    B = x_t.shape[0]
    # Batch tile: multiple of 8 sublanes, capped at `tile_b`; pad B to a tile multiple.
    tb = min(tile_b, _round_up(B, 8))
    B_pad = _round_up(B, tb)

    # Lane-dense, zero-padded (B_pad, 128) input slab: cols 0-1 = x_t, col 2 = t.
    x = jnp.zeros((B_pad, IN_PAD), jnp.float32)
    x = x.at[:B, 0:2].set(x_t)
    x = x.at[:B, 2].set(t)
    x = x.astype(jnp.bfloat16)

    grid = (B_pad // tb,)

    def resident(a):
        # Full-array block, constant index_map: stays VMEM-resident across steps.
        return pl.BlockSpec(a.shape, lambda i: (0,) * a.ndim)

    cost = pl.CostEstimate(
        flops=2 * B_pad * (IN_PAD * DIM + DIM * DIM + DIM * DIM + DIM * OUT_PAD),
        transcendentals=2 * 3 * B_pad * DIM,  # exp + log1p per hidden element
        bytes_accessed=(
            x.size * x.dtype.itemsize
            + B_pad * OUT_PAD * 4
            + sum(int(v.size) * v.dtype.itemsize for v in params.values())),
    )

    out_pad = pl.pallas_call(
        mlp_kernel,
        out_shape=jax.ShapeDtypeStruct((B_pad, OUT_PAD), jnp.float32),
        grid=grid,
        in_specs=[
            pl.BlockSpec((tb, IN_PAD), lambda i: (i, 0)),
            resident(params["w1"]), resident(params["b1"]),
            resident(params["w2"]), resident(params["b2"]),
            resident(params["w3"]), resident(params["b3"]),
            resident(params["w4"]), resident(params["b4"]),
        ],
        out_specs=pl.BlockSpec((tb, OUT_PAD), lambda i: (i, 0)),
        compiler_params=pltpu.CompilerParams(
            dimension_semantics=("parallel",)),
        cost_estimate=cost,
    )(x,
      params["w1"], params["b1"],
      params["w2"], params["b2"],
      params["w3"], params["b3"],
      params["w4"], params["b4"])

    return out_pad[:B, :2]


def init_params(key):
    """Deterministic init matching the PyTorch module's parameter shapes
    (nn.Linear default: U(-1/sqrt(fan_in), 1/sqrt(fan_in)))."""
    keys = jax.random.split(key, 8)

    def lin(kw, kb, fan_in, fan_out):
        bound = 1.0 / (fan_in ** 0.5)
        w = jax.random.uniform(kw, (fan_in, fan_out), jnp.float32, -bound, bound)
        b = jax.random.uniform(kb, (1, fan_out), jnp.float32, -bound, bound)
        return w, b

    w1, b1 = lin(keys[0], keys[1], 3, DIM)
    w2, b2 = lin(keys[2], keys[3], DIM, DIM)
    w3, b3 = lin(keys[4], keys[5], DIM, DIM)
    w4, b4 = lin(keys[6], keys[7], DIM, 2)

    # Zero padding for lane/sublane-dense layouts:
    #   w1: (3, 512)  -> (128, 512)  (matches the 128-wide padded input)
    #   w4: (512, 2)  -> (512, 128)  (lane-dense output slab)
    w1_pad = jnp.zeros((IN_PAD, DIM), jnp.float32).at[:3].set(w1)
    w4_pad = jnp.zeros((DIM, OUT_PAD), jnp.float32).at[:, :2].set(w4)
    b4_pad = jnp.zeros((1, OUT_PAD), jnp.float32).at[:, :2].set(b4)

    bf16 = jnp.bfloat16
    return {"w1": w1_pad.astype(bf16), "b1": b1,
            "w2": w2.astype(bf16), "b2": b2,
            "w3": w3.astype(bf16), "b3": b3,
            "w4": w4_pad.astype(bf16), "b4": b4_pad}


def reference_forward(params, x_t, t):
    """Pure-JAX reference with the same bf16-matmul / f32-accumulate math."""
    B = x_t.shape[0]
    x = jnp.zeros((B, IN_PAD), jnp.float32)
    x = x.at[:, 0:2].set(x_t)
    x = x.at[:, 2].set(t)
    x = x.astype(jnp.bfloat16)
    h = _softplus(jnp.dot(x, params["w1"], preferred_element_type=jnp.float32)
                  + params["b1"]).astype(jnp.bfloat16)
    h = _softplus(jnp.dot(h, params["w2"], preferred_element_type=jnp.float32)
                  + params["b2"]).astype(jnp.bfloat16)
    h = _softplus(jnp.dot(h, params["w3"], preferred_element_type=jnp.float32)
                  + params["b3"]).astype(jnp.bfloat16)
    out = jnp.dot(h, params["w4"], preferred_element_type=jnp.float32) + params["b4"]
    return out[:, :2]


if __name__ == "__main__":
    key = jax.random.PRNGKey(0)
    kp, kx, kt = jax.random.split(key, 3)

    params = init_params(kp)

    # Small test (single 8-row tile).
    B = 8
    x_t = jax.random.normal(kx, (B, 2), jnp.float32)
    t = jax.random.uniform(kt, (B,), jnp.float32)

    out = generator_forward(params, x_t, t)
    out = jax.block_until_ready(out)

    ref = reference_forward(params, x_t, t)
    assert out.shape == (B, 2), out.shape
    assert jnp.allclose(out, ref, atol=2e-3, rtol=2e-3), \
        float(jnp.max(jnp.abs(out - ref)))

    # Multi-tile test exercising the batch grid (3 tiles of 128, with padding).
    B2 = 300
    x_t2 = jax.random.normal(kx, (B2, 2), jnp.float32)
    t2 = jax.random.uniform(kt, (B2,), jnp.float32)
    out2 = jax.block_until_ready(generator_forward(params, x_t2, t2, tile_b=128))
    ref2 = reference_forward(params, x_t2, t2)
    assert out2.shape == (B2, 2), out2.shape
    assert jnp.allclose(out2, ref2, atol=2e-3, rtol=2e-3), \
        float(jnp.max(jnp.abs(out2 - ref2)))

    print("KERNEL_OK")
</pallas_src>

<mosaic_0001>
module attributes {stable_mosaic.version = 11 : i64} {
  func.func @mlp_kernel(%arg0: i32, %arg1: memref<8x128xbf16, #tpu.memory_space<vmem>>, %arg2: memref<128x512xbf16, #tpu.memory_space<vmem>>, %arg3: memref<1x512xf32, #tpu.memory_space<vmem>>, %arg4: memref<512x512xbf16, #tpu.memory_space<vmem>>, %arg5: memref<1x512xf32, #tpu.memory_space<vmem>>, %arg6: memref<512x512xbf16, #tpu.memory_space<vmem>>, %arg7: memref<1x512xf32, #tpu.memory_space<vmem>>, %arg8: memref<512x128xbf16, #tpu.memory_space<vmem>>, %arg9: memref<1x128xf32, #tpu.memory_space<vmem>>, %arg10: memref<8x128xf32, #tpu.memory_space<vmem>>) attributes {dimension_semantics = [#tpu.dimension_semantics<parallel>], iteration_bounds = array<i64: 1>, scalar_prefetch = 0 : i64, scratch_operands = 0 : i64, tpu.core_type = #tpu.core_type<tc>, window_params = [{transform_indices = @transform_0, window_bounds = array<i64: 8, 128>}, {pipeline_mode = #tpu.pipeline_mode<synchronous>, transform_indices = @transform_1, window_bounds = array<i64: 128, 512>}, {pipeline_mode = #tpu.pipeline_mode<synchronous>, transform_indices = @transform_2, window_bounds = array<i64: 1, 512>}, {pipeline_mode = #tpu.pipeline_mode<synchronous>, transform_indices = @transform_3, window_bounds = array<i64: 512, 512>}, {pipeline_mode = #tpu.pipeline_mode<synchronous>, transform_indices = @transform_4, window_bounds = array<i64: 1, 512>}, {pipeline_mode = #tpu.pipeline_mode<synchronous>, transform_indices = @transform_5, window_bounds = array<i64: 512, 512>}, {pipeline_mode = #tpu.pipeline_mode<synchronous>, transform_indices = @transform_6, window_bounds = array<i64: 1, 512>}, {pipeline_mode = #tpu.pipeline_mode<synchronous>, transform_indices = @transform_7, window_bounds = array<i64: 512, 128>}, {pipeline_mode = #tpu.pipeline_mode<synchronous>, transform_indices = @transform_8, window_bounds = array<i64: 1, 128>}, {transform_indices = @transform_9, window_bounds = array<i64: 8, 128>}]} {
    %c0 = arith.constant 0 : index
    %c0_0 = arith.constant 0 : index
    %0 = vector.load %arg1[%c0, %c0_0] : memref<8x128xbf16, #tpu.memory_space<vmem>>, vector<8x128xbf16>
    %c0_1 = arith.constant 0 : index
    %c0_2 = arith.constant 0 : index
    %1 = vector.load %arg2[%c0_1, %c0_2] : memref<128x512xbf16, #tpu.memory_space<vmem>>, vector<128x512xbf16>
    %cst = arith.constant dense<0.000000e+00> : vector<8x512xf32>
    %2 = tpu.matmul %0, %1, %cst {dimension_numbers = #tpu.dot_dimension_numbers<[1], [0], [0], [1], [0, 0, 1, 1], [], []>} : vector<8x128xbf16>, vector<128x512xbf16>, vector<8x512xf32> -> vector<8x512xf32>
    %c0_3 = arith.constant 0 : index
    %c0_4 = arith.constant 0 : index
    %3 = vector.load %arg3[%c0_3, %c0_4] : memref<1x512xf32, #tpu.memory_space<vmem>>, vector<1x512xf32>
    %4 = vector.broadcast %3 : vector<1x512xf32> to vector<8x512xf32>
    %5 = arith.addf %2, %4 : vector<8x512xf32>
    %cst_5 = arith.constant 2.000000e+01 : f32
    %6 = vector.broadcast %cst_5 : f32 to vector<8x512xf32>
    %7 = arith.cmpf ogt, %5, %6 : vector<8x512xf32>
    %8 = math.exp %5 : vector<8x512xf32>
    %9 = math.log1p %8 : vector<8x512xf32>
    %10 = arith.select %7, %5, %9 : vector<8x512xi1>, vector<8x512xf32>
    %11 = arith.truncf %10 : vector<8x512xf32> to vector<8x512xbf16>
    %c0_6 = arith.constant 0 : index
    %c0_7 = arith.constant 0 : index
    %12 = vector.load %arg4[%c0_6, %c0_7] : memref<512x512xbf16, #tpu.memory_space<vmem>>, vector<512x512xbf16>
    %cst_8 = arith.constant dense<0.000000e+00> : vector<8x512xf32>
    %13 = tpu.matmul %11, %12, %cst_8 {dimension_numbers = #tpu.dot_dimension_numbers<[1], [0], [0], [1], [0, 0, 1, 1], [], []>} : vector<8x512xbf16>, vector<512x512xbf16>, vector<8x512xf32> -> vector<8x512xf32>
    %c0_9 = arith.constant 0 : index
    %c0_10 = arith.constant 0 : index
    %14 = vector.load %arg5[%c0_9, %c0_10] : memref<1x512xf32, #tpu.memory_space<vmem>>, vector<1x512xf32>
    %15 = vector.broadcast %14 : vector<1x512xf32> to vector<8x512xf32>
    %16 = arith.addf %13, %15 : vector<8x512xf32>
    %cst_11 = arith.constant 2.000000e+01 : f32
    %17 = vector.broadcast %cst_11 : f32 to vector<8x512xf32>
    %18 = arith.cmpf ogt, %16, %17 : vector<8x512xf32>
    %19 = math.exp %16 : vector<8x512xf32>
    %20 = math.log1p %19 : vector<8x512xf32>
    %21 = arith.select %18, %16, %20 : vector<8x512xi1>, vector<8x512xf32>
    %22 = arith.truncf %21 : vector<8x512xf32> to vector<8x512xbf16>
    %c0_12 = arith.constant 0 : index
    %c0_13 = arith.constant 0 : index
    %23 = vector.load %arg6[%c0_12, %c0_13] : memref<512x512xbf16, #tpu.memory_space<vmem>>, vector<512x512xbf16>
    %cst_14 = arith.constant dense<0.000000e+00> : vector<8x512xf32>
    %24 = tpu.matmul %22, %23, %cst_14 {dimension_numbers = #tpu.dot_dimension_numbers<[1], [0], [0], [1], [0, 0, 1, 1], [], []>} : vector<8x512xbf16>, vector<512x512xbf16>, vector<8x512xf32> -> vector<8x512xf32>
    %c0_15 = arith.constant 0 : index
    %c0_16 = arith.constant 0 : index
    %25 = vector.load %arg7[%c0_15, %c0_16] : memref<1x512xf32, #tpu.memory_space<vmem>>, vector<1x512xf32>
    %26 = vector.broadcast %25 : vector<1x512xf32> to vector<8x512xf32>
    %27 = arith.addf %24, %26 : vector<8x512xf32>
    %cst_17 = arith.constant 2.000000e+01 : f32
    %28 = vector.broadcast %cst_17 : f32 to vector<8x512xf32>
    %29 = arith.cmpf ogt, %27, %28 : vector<8x512xf32>
    %30 = math.exp %27 : vector<8x512xf32>
    %31 = math.log1p %30 : vector<8x512xf32>
    %32 = arith.select %29, %27, %31 : vector<8x512xi1>, vector<8x512xf32>
    %33 = arith.truncf %32 : vector<8x512xf32> to vector<8x512xbf16>
    %c0_18 = arith.constant 0 : index
    %c0_19 = arith.constant 0 : index
    %34 = vector.load %arg8[%c0_18, %c0_19] : memref<512x128xbf16, #tpu.memory_space<vmem>>, vector<512x128xbf16>
    %cst_20 = arith.constant dense<0.000000e+00> : vector<8x128xf32>
    %35 = tpu.matmul %33, %34, %cst_20 {dimension_numbers = #tpu.dot_dimension_numbers<[1], [0], [0], [1], [0, 0, 1, 1], [], []>} : vector<8x512xbf16>, vector<512x128xbf16>, vector<8x128xf32> -> vector<8x128xf32>
    %c0_21 = arith.constant 0 : index
    %c0_22 = arith.constant 0 : index
    %36 = vector.load %arg9[%c0_21, %c0_22] : memref<1x128xf32, #tpu.memory_space<vmem>>, vector<1x128xf32>
    %37 = vector.broadcast %36 : vector<1x128xf32> to vector<8x128xf32>
    %38 = arith.addf %35, %37 : vector<8x128xf32>
    %c0_23 = arith.constant 0 : index
    %c0_24 = arith.constant 0 : index
    %39 = vector.load %arg10[%c0_23, %c0_24] : memref<8x128xf32, #tpu.memory_space<vmem>>, vector<8x128xf32>
    tpu.vector_store %arg10[%c0_23, %c0_24], %38 {strides = array<i32>} : memref<8x128xf32, #tpu.memory_space<vmem>>, vector<8x128xf32>,
    return
  }
  func.func @transform_0(%arg0: i32) -> (i32, i32) {
    %c0_i32 = arith.constant 0 : i32
    %c0_i32_0 = arith.constant 0 : i32
    return %arg0, %c0_i32 : i32, i32
  }
  func.func @transform_1(%arg0: i32) -> (i32, i32) {
    %c0_i32 = arith.constant 0 : i32
    %c0_i32_0 = arith.constant 0 : i32
    %c0_i32_1 = arith.constant 0 : i32
    return %c0_i32, %c0_i32_0 : i32, i32
  }
  func.func @transform_2(%arg0: i32) -> (i32, i32) {
    %c0_i32 = arith.constant 0 : i32
    %c0_i32_0 = arith.constant 0 : i32
    %c0_i32_1 = arith.constant 0 : i32
    return %c0_i32, %c0_i32_0 : i32, i32
  }
  func.func @transform_3(%arg0: i32) -> (i32, i32) {
    %c0_i32 = arith.constant 0 : i32
    %c0_i32_0 = arith.constant 0 : i32
    %c0_i32_1 = arith.constant 0 : i32
    return %c0_i32, %c0_i32_0 : i32, i32
  }
  func.func @transform_4(%arg0: i32) -> (i32, i32) {
    %c0_i32 = arith.constant 0 : i32
    %c0_i32_0 = arith.constant 0 : i32
    %c0_i32_1 = arith.constant 0 : i32
    return %c0_i32, %c0_i32_0 : i32, i32
  }
  func.func @transform_5(%arg0: i32) -> (i32, i32) {
    %c0_i32 = arith.constant 0 : i32
    %c0_i32_0 = arith.constant 0 : i32
    %c0_i32_1 = arith.constant 0 : i32
    return %c0_i32, %c0_i32_0 : i32, i32
  }
  func.func @transform_6(%arg0: i32) -> (i32, i32) {
    %c0_i32 = arith.constant 0 : i32
    %c0_i32_0 = arith.constant 0 : i32
    %c0_i32_1 = arith.constant 0 : i32
    return %c0_i32, %c0_i32_0 : i32, i32
  }
  func.func @transform_7(%arg0: i32) -> (i32, i32) {
    %c0_i32 = arith.constant 0 : i32
    %c0_i32_0 = arith.constant 0 : i32
    %c0_i32_1 = arith.constant 0 : i32
    return %c0_i32, %c0_i32_0 : i32, i32
  }
  func.func @transform_8(%arg0: i32) -> (i32, i32) {
    %c0_i32 = arith.constant 0 : i32
    %c0_i32_0 = arith.constant 0 : i32
    %c0_i32_1 = arith.constant 0 : i32
    return %c0_i32, %c0_i32_0 : i32, i32
  }
  func.func @transform_9(%arg0: i32) -> (i32, i32) {
    %c0_i32 = arith.constant 0 : i32
    %c0_i32_0 = arith.constant 0 : i32
    return %arg0, %c0_i32 : i32, i32
  }
}

</mosaic_0001>

<bundles_post_ra>
// kernel: generator_forward.1
= control target key start
LH: loop header
LB: loop body
LE: loop exit
PB: predicated region body
PF: predicated region fallthrough
CT: control target
= control target key end

     0   :  { %14 = vsyncpa [#allocation3], 0  ;;  %s4045_s0 = inlined_call_operand.vmem [shape: bf16[8,128], index: 0, kind: input, shape index: {}]   ;;  %s4046_s1 = inlined_call_operand.hbm [shape: bf16[128,512], index: 1, kind: input, shape index: {}]   ;;  %s4047_s2 = inlined_call_operand.vmem [shape: f32[1,512], index: 2, kind: input, shape index: {}]   ;;  %s4048_s3 = inlined_call_operand.hbm [shape: bf16[512,512], index: 3, kind: input, shape index: {}]   ;;  %s4049_s4 = inlined_call_operand.vmem [shape: f32[1,512], index: 4, kind: input, shape index: {}]   ;;  %s4050_s5 = inlined_call_operand.hbm [shape: bf16[512,512], index: 5, kind: input, shape index: {}]   ;;  %s4051_s6 = inlined_call_operand.vmem [shape: f32[1,512], index: 6, kind: input, shape index: {}]   ;;  %s4052_s7 = inlined_call_operand.hbm [shape: bf16[512,128], index: 7, kind: input, shape index: {}]   ;;  %s4053_s8 = inlined_call_operand.vmem [shape: f32[1,128], index: 8, kind: input, shape index: {}]   ;;  %s4054_s9 = inlined_call_operand.vmem [shape: f32[8,128], index: 9, kind: output, shape index: {}]  }
   0x1   :  { %15 = vsyncpa [#allocation5], 0 }
   0x2   :  { %16 = vsyncpa [#allocation8], 0  ;;  %s3816_s30 = smov [#allocation4]   ;;  %s3817_s11 = smov [#allocation2]  }
   0x3   :  { %s38_s10 = sshll.u32 %s3816_s30, 4  ;;  %s24_s12 = sshll.u32 %s3817_s11, 4  ;;  %s39_s10 = int_to_ptr.vmem [resolvable:$true] %s38_s10  ;;  %s3875_s12 = int_to_ptr.vmem [resolvable:$true] %s24_s12 }
   0x4   :  { %s3722_s15 = scalar_lea.hbm %s4048_s3, 16384 }
   0x5   :  { %p3723_p0 = scmp.ne.s32.totalorder %s4048_s3, %s3722_s15  ;;  %p3726_p1 = scmp.lt.u32.totalorder %s3722_s15, %s4048_s3 }
   0x7   :  { %p3728_p2 = pnand %p3726_p1, %p3723_p0 }
   0x9   :  { %3731 = shalt.err (!%p3728_p2)
}
   0xa   :  { %s3732_s20 = scalar_lea.vmem %s39_s10, 16384  ;;  %p3737_p4 = scmp.lt.s32.totalorder %s39_s10, %s39_s10 }
   0xb   :  { %p3733_p3 = scmp.ne.s32.totalorder %s39_s10, %s3732_s20  ;;  %p3738_p5 = scmp.lt.s32.totalorder %s3732_s20, %s3732_s20 }
   0xd   :  { %p3739_p6 = por %p3738_p5, %p3737_p4 }
   0xf   :  { %p3740_p7 = pnand %p3739_p6, %p3733_p3 }
  0x11   :  { %3743 = shalt.err (!%p3740_p7)
}
  0x12   :  { %s3818_s21 = smov 256   ;;  %s3819_s22 = smov 16  }
  0x13   :  { %44 = dma.hbm_to_vmem [thread:$0]  %s4048_s3, 16384, %s39_s10, [#allocation5], %s3818_s21, %s3818_s21, %s3819_s22  }
  0x14   :  { %s3744_s27 = scalar_lea.hbm %s4046_s1, 4096 }
  0x15   :  { %p3745_p8 = scmp.ne.s32.totalorder %s4046_s1, %s3744_s27  ;;  %p3748_p9 = scmp.lt.u32.totalorder %s3744_s27, %s4046_s1 }
  0x17   :  { %p3750_p10 = pnand %p3748_p9, %p3745_p8 }
  0x19   :  { %3753 = shalt.err (!%p3750_p10)
}
  0x1a   :  { %s3754_s13 = scalar_lea.vmem %s3875_s12, 4096  ;;  %p3759_p12 = scmp.lt.s32.totalorder %s3875_s12, %s3875_s12 }
  0x1b   :  { %p3755_p11 = scmp.ne.s32.totalorder %s3875_s12, %s3754_s13  ;;  %p3760_p13 = scmp.lt.s32.totalorder %s3754_s13, %s3754_s13 }
  0x1d   :  { %p3761_p0 = por %p3760_p13, %p3759_p12 }
  0x1f   :  { %p3762_p1 = pnand %p3761_p0, %p3755_p11 }
  0x21   :  { %3765 = shalt.err (!%p3762_p1)
}
  0x22   :  { %30 = dma.hbm_to_vmem [thread:$0]  %s4046_s1, 4096, %s3875_s12, [#allocation3], %s3818_s21, %s3818_s21, %s3819_s22  }
  0x23   :  { %s3820_s14 = smov [#allocation6]   ;;  %s3821_s16 = smov [#allocation7]  }
  0x24   :  { %s52_s15 = sshll.u32 %s3820_s14, 4  ;;  %s66_s17 = sshll.u32 %s3821_s16, 4  ;;  %s53_s15 = int_to_ptr.vmem [resolvable:$true] %s52_s15  ;;  %s3912_s17 = int_to_ptr.vmem [resolvable:$true] %s66_s17 }
  0x25   :  { %s3766_s20 = scalar_lea.hbm %s4050_s5, 16384 }
  0x26   :  { %p3767_p2 = scmp.ne.s32.totalorder %s4050_s5, %s3766_s20  ;;  %p3770_p3 = scmp.lt.u32.totalorder %s3766_s20, %s4050_s5 }
  0x28   :  { %p3772_p4 = pnand %p3770_p3, %p3767_p2 }
  0x2a   :  { %3775 = shalt.err (!%p3772_p4)
}
  0x2b   :  { %s3776_s1 = scalar_lea.vmem %s53_s15, 16384  ;;  %p3781_p6 = scmp.lt.s32.totalorder %s53_s15, %s53_s15 }
  0x2c   :  { %p3777_p5 = scmp.ne.s32.totalorder %s53_s15, %s3776_s1  ;;  %p3782_p7 = scmp.lt.s32.totalorder %s3776_s1, %s3776_s1 }
  0x2e   :  { %p3783_p8 = por %p3782_p7, %p3781_p6 }
  0x30   :  { %p3784_p9 = pnand %p3783_p8, %p3777_p5 }
  0x32   :  { %3787 = shalt.err (!%p3784_p9)
}
  0x33   :  { %58 = dma.hbm_to_vmem [thread:$0]  %s4050_s5, 16384, %s53_s15, [#allocation5], %s3818_s21, %s3818_s21, %s3819_s22  }
  0x34   :  { %s3788_s30 = scalar_lea.hbm %s4052_s7, 4096 }
  0x35   :  { %p3789_p10 = scmp.ne.s32.totalorder %s4052_s7, %s3788_s30  ;;  %p3792_p11 = scmp.lt.u32.totalorder %s3788_s30, %s4052_s7 }
  0x37   :  { %p3794_p12 = pnand %p3792_p11, %p3789_p10 }
  0x39   :  { %3797 = shalt.err (!%p3794_p12)
}
  0x3a   :  { %s3798_s14 = scalar_lea.vmem %s3912_s17, 4096  ;;  %p3803_p0 = scmp.lt.s32.totalorder %s3912_s17, %s3912_s17 }
  0x3b   :  { %p3799_p13 = scmp.ne.s32.totalorder %s3912_s17, %s3798_s14  ;;  %p3804_p1 = scmp.lt.s32.totalorder %s3798_s14, %s3798_s14 }
  0x3d   :  { %p3805_p2 = por %p3804_p1, %p3803_p0 }
  0x3f   :  { %p3806_p3 = pnand %p3805_p2, %p3799_p13 }
  0x41   :  { %3809 = shalt.err (!%p3806_p3)
}
  0x42   :  { %s3822_s5 = smov 64   ;;  %s3823_s21 = smov 4  }
  0x43   :  { %72 = dma.hbm_to_vmem [thread:$0]  %s4052_s7, 4096, %s3912_s17, [#allocation8], %s3822_s5, %s3822_s5, %s3823_s21  }
  0x44   :  { %3810 = dma.done.wait [#allocation3], 4096  }
  0x45   :  { %3811 = vsyncadd [#allocation3], 4294963200 }
  0x46   :  { %3812 = dma.done.wait [#allocation5], 32768  }
  0x47   :  { %3813 = vsyncadd [#allocation5], 4294934528 }
  0x48   :  { %3814 = dma.done.wait [#allocation8], 4096  }
  0x49   :  { %3815 = vsyncadd [#allocation8], 4294963200  ;;  %v3824_v0 = vmov 0   ;;  %v3210_v1 = vld [vmem:[#allocation2 + $0x4] ss:$16 sps:$4 sm:$0xff]  }
  0x4a   :  { %335 = vmatprep.mubr.bf16.mxu0 %v3824_v0  ;;  %376 = vmatprep.mubr.bf16.mxu1 %v3824_v0  ;;  %v3212_v2 = vld [vmem:[#allocation2] ss:$16 sps:$4 sm:$0xff]   ;;  %v3213_v3 = vld [vmem:[#allocation2 + $0x24] ss:$16 sps:$4 sm:$0xff]   ;;  %v3234_v10 = vld [vmem:[#allocation2 + $0xc] ss:$16 sps:$4 sm:$0xff]  }
  0x4b   :  { %303 = vmatprep.subr.bf16.mxu0 %v3210_v1  ;;  %v3215_v4 = vld [vmem:[#allocation2 + $0x20] ss:$16 sps:$4 sm:$0xff]   ;;  %v3216_v5 = vld [vmem:[#allocation2 + $0x44] ss:$16 sps:$4 sm:$0xff]   ;;  %v3236_v11 = vld [vmem:[#allocation2 + $0x8] ss:$16 sps:$4 sm:$0xff]   ;;  %344 = vmatprep.subr.bf16.mxu1 %v3234_v10 }
  0x4c   :  { %304 = vmatpush1.bf16.msra.mxu0 %v3212_v2  ;;  %v3218_v6 = vld [vmem:[#allocation2 + $0x40] ss:$16 sps:$4 sm:$0xff]   ;;  %v3219_v7 = vld [vmem:[#allocation2 + $0x64] ss:$16 sps:$4 sm:$0xff]   ;;  %v3237_v12 = vld [vmem:[#allocation2 + $0x2c] ss:$16 sps:$4 sm:$0xff]   ;;  %345 = vmatpush1.bf16.msra.mxu1 %v3236_v11 }
  0x4d   :  { %305 = vmatprep.subr.bf16.mxu0 %v3213_v3  ;;  %v3221_v8 = vld [vmem:[#allocation2 + $0x60] ss:$16 sps:$4 sm:$0xff]   ;;  %v3222_v9 = vld [vmem:[#allocation2 + $0x84] ss:$16 sps:$4 sm:$0xff]   ;;  %v3239_v14 = vld [vmem:[#allocation2 + $0x28] ss:$16 sps:$4 sm:$0xff]   ;;  %346 = vmatprep.subr.bf16.mxu1 %v3237_v12 }
  0x4e   :  { %v3224_v13 = vld [vmem:[#allocation2 + $0x80] ss:$16 sps:$4 sm:$0xff]   ;;  %v3240_v15 = vld [vmem:[#allocation2 + $0x4c] ss:$16 sps:$4 sm:$0xff]   ;;  %v3225_v16 = vld [vmem:[#allocation2 + $0xa4] ss:$16 sps:$4 sm:$0xff]  }
  0x4f   :  { %v3227_v17 = vld [vmem:[#allocation2 + $0xa0] ss:$16 sps:$4 sm:$0xff]   ;;  %v3242_v18 = vld [vmem:[#allocation2 + $0x48] ss:$16 sps:$4 sm:$0xff]   ;;  %v3243_v19 = vld [vmem:[#allocation2 + $0x6c] ss:$16 sps:$4 sm:$0xff]  }
  0x50   :  { %306 = vmatpush1.bf16.msra.mxu0 %v3215_v4  ;;  %347 = vmatpush1.bf16.msra.mxu1 %v3239_v14  ;;  %v3228_v20 = vld [vmem:[#allocation2 + $0xc4] ss:$16 sps:$4 sm:$0xff]   ;;  %v3230_v21 = vld [vmem:[#allocation2 + $0xc0] ss:$16 sps:$4 sm:$0xff]   ;;  %v3245_v22 = vld [vmem:[#allocation2 + $0x68] ss:$16 sps:$4 sm:$0xff]  }
  0x51   :  { %307 = vmatprep.subr.bf16.mxu0 %v3216_v5  ;;  %348 = vmatprep.subr.bf16.mxu1 %v3240_v15  ;;  %v3246_v23 = vld [vmem:[#allocation2 + $0x8c] ss:$16 sps:$4 sm:$0xff]   ;;  %v3231_v24 = vld [vmem:[#allocation2 + $0xe4] ss:$16 sps:$4 sm:$0xff]   ;;  %v3233_v25 = vld [vmem:[#allocation2 + $0xe0] ss:$16 sps:$4 sm:$0xff]  }
  0x52   :  { %v3248_v26 = vld [vmem:[#allocation2 + $0x88] ss:$16 sps:$4 sm:$0xff]   ;;  %v3249_v27 = vld [vmem:[#allocation2 + $0xac] ss:$16 sps:$4 sm:$0xff]   ;;  %v3260_v28 = vld [vmem:[#allocation4 + $0x4] ss:$16 sps:$4 sm:$0xff]  }
  0x53   :  { %v88_v29 = vld [vmem:[%s4045_s0] sm:$0xf]  ;;  %v3251_v30 = vld [vmem:[#allocation2 + $0xa8] ss:$16 sps:$4 sm:$0xff]   ;;  %v3252_v31 = vld [vmem:[#allocation2 + $0xcc] ss:$16 sps:$4 sm:$0xff]  }
  0x54   :  { %308 = vmatpush1.bf16.msra.mxu0 %v3218_v6  ;;  %349 = vmatpush1.bf16.msra.mxu1 %v3242_v18  ;;  %v3258_v32 = vld [vmem:[#allocation4] ss:$16 sps:$4 sm:$0xff]   ;;  %v3266_v33 = vld [vmem:[#allocation4 + $0x24] ss:$16 sps:$4 sm:$0xff]   ;;  %v3254_v34 = vld [vmem:[#allocation2 + $0xc8] ss:$16 sps:$4 sm:$0xff]  }
  0x55   :  { %309 = vmatprep.subr.bf16.mxu0 %v3219_v7  ;;  %350 = vmatprep.subr.bf16.mxu1 %v3243_v19  ;;  %v3255_v35 = vld [vmem:[#allocation2 + $0xec] ss:$16 sps:$4 sm:$0xff]   ;;  %v3264_v36 = vld [vmem:[#allocation4 + $0x20] ss:$16 sps:$4 sm:$0xff]   ;;  %v3272_v37 = vld [vmem:[#allocation4 + $0x44] ss:$16 sps:$4 sm:$0xff]  }
  0x56   :  { %v3257_v38 = vld [vmem:[#allocation2 + $0xe8] ss:$16 sps:$4 sm:$0xff]   ;;  %v3263_v39 = vld [vmem:[#allocation4 + $0xc] ss:$16 sps:$4 sm:$0xff]   ;;  %v3270_v40 = vld [vmem:[#allocation4 + $0x40] ss:$16 sps:$4 sm:$0xff]  }
  0x57   :  { %v3261_v41 = vld [vmem:[#allocation4 + $0x8] ss:$16 sps:$4 sm:$0xff]   ;;  %v3278_v42 = vld [vmem:[#allocation4 + $0x64] ss:$16 sps:$4 sm:$0xff]   ;;  %v3269_v43 = vld [vmem:[#allocation4 + $0x2c] ss:$16 sps:$4 sm:$0xff]  }
  0x58   :  { %310 = vmatpush1.bf16.msra.mxu0 %v3221_v8  ;;  %351 = vmatpush1.bf16.msra.mxu1 %v3245_v22  ;;  %v3276_v44 = vld [vmem:[#allocation4 + $0x60] ss:$16 sps:$4 sm:$0xff]   ;;  %v3284_v45 = vld [vmem:[#allocation4 + $0x84] ss:$16 sps:$4 sm:$0xff]   ;;  %v3267_v46 = vld [vmem:[#allocation4 + $0x28] ss:$16 sps:$4 sm:$0xff]  }
  0x59   :  { %311 = vmatprep.subr.bf16.mxu0 %v3222_v9  ;;  %352 = vmatprep.subr.bf16.mxu1 %v3246_v23  ;;  %v3275_v47 = vld [vmem:[#allocation4 + $0x4c] ss:$16 sps:$4 sm:$0xff]   ;;  %v3282_v48 = vld [vmem:[#allocation4 + $0x80] ss:$16 sps:$4 sm:$0xff]   ;;  %v3290_v49 = vld [vmem:[#allocation4 + $0xa4] ss:$16 sps:$4 sm:$0xff]  }
  0x5a   :  { %v3273_v50 = vld [vmem:[#allocation4 + $0x48] ss:$16 sps:$4 sm:$0xff]   ;;  %v3281_v51 = vld [vmem:[#allocation4 + $0x6c] ss:$16 sps:$4 sm:$0xff]   ;;  %v3288_v52 = vld [vmem:[#allocation4 + $0xa0] ss:$16 sps:$4 sm:$0xff]  }
  0x5b   :  { %v3296_v53 = vld [vmem:[#allocation4 + $0xc4] ss:$16 sps:$4 sm:$0xff]   ;;  %v3279_v54 = vld [vmem:[#allocation4 + $0x68] ss:$16 sps:$4 sm:$0xff]   ;;  %v3287_v55 = vld [vmem:[#allocation4 + $0x8c] ss:$16 sps:$4 sm:$0xff]  }
  0x5c   :  { %312 = vmatpush1.bf16.msra.mxu0 %v3224_v13  ;;  %353 = vmatpush1.bf16.msra.mxu1 %v3248_v26  ;;  %v3294_v56 = vld [vmem:[#allocation4 + $0xc0] ss:$16 sps:$4 sm:$0xff]   ;;  %v3285_v57 = vld [vmem:[#allocation4 + $0x88] ss:$16 sps:$4 sm:$0xff]   ;;  %v3293_v58 = vld [vmem:[#allocation4 + $0xac] ss:$16 sps:$4 sm:$0xff]  }
  0x5d   :  { %313 = vmatprep.subr.bf16.mxu0 %v3225_v16  ;;  %354 = vmatprep.subr.bf16.mxu1 %v3249_v27  ;;  %v3291_v59 = vld [vmem:[#allocation4 + $0xa8] ss:$16 sps:$4 sm:$0xff]   ;;  %v3299_v60 = vld [vmem:[#allocation4 + $0xcc] ss:$16 sps:$4 sm:$0xff]   ;;  %v3302_v62 = vld [vmem:[#allocation4 + $0xe4] ss:$16 sps:$4 sm:$0xff]  }
  0x5e   :  { %v3297_v61 = vld [vmem:[#allocation4 + $0xc8] ss:$16 sps:$4 sm:$0xff]   ;;  %v3305_v63 = vld [vmem:[#allocation4 + $0xec] ss:$16 sps:$4 sm:$0xff]   ;;  %v3300_v0 = vld [vmem:[#allocation4 + $0xe0] ss:$16 sps:$4 sm:$0xff]  }
  0x5f   :  { %v3303_v1 = vld [vmem:[#allocation4 + $0xe8] ss:$16 sps:$4 sm:$0xff]   ;;  %v3308_v2 = vld [vmem:[#allocation4 + $0x104] ss:$16 sps:$4 sm:$0xff]   ;;  %v3311_v3 = vld [vmem:[#allocation4 + $0x10c] ss:$16 sps:$4 sm:$0xff]  }
  0x60   :  { %314 = vmatpush1.bf16.msra.mxu0 %v3227_v17  ;;  %355 = vmatpush1.bf16.msra.mxu1 %v3251_v30  ;;  %v3306_v4 = vld [vmem:[#allocation4 + $0x100] ss:$16 sps:$4 sm:$0xff]   ;;  %v3309_v5 = vld [vmem:[#allocation4 + $0x108] ss:$16 sps:$4 sm:$0xff]   ;;  %v3314_v6 = vld [vmem:[#allocation4 + $0x124] ss:$16 sps:$4 sm:$0xff]  }
  0x61   :  { %315 = vmatprep.subr.bf16.mxu0 %v3228_v20  ;;  %356 = vmatprep.subr.bf16.mxu1 %v3252_v31  ;;  %v3317_v7 = vld [vmem:[#allocation4 + $0x12c] ss:$16 sps:$4 sm:$0xff]   ;;  %v3312_v8 = vld [vmem:[#allocation4 + $0x120] ss:$16 sps:$4 sm:$0xff]   ;;  %v3315_v9 = vld [vmem:[#allocation4 + $0x128] ss:$16 sps:$4 sm:$0xff]  }
  0x62   :  { %v3320_v10 = vld [vmem:[#allocation4 + $0x144] ss:$16 sps:$4 sm:$0xff]   ;;  %v3323_v11 = vld [vmem:[#allocation4 + $0x14c] ss:$16 sps:$4 sm:$0xff]   ;;  %v3318_v12 = vld [vmem:[#allocation4 + $0x140] ss:$16 sps:$4 sm:$0xff]  }
  0x63   :  { %v3321_v13 = vld [vmem:[#allocation4 + $0x148] ss:$16 sps:$4 sm:$0xff]   ;;  %v3326_v14 = vld [vmem:[#allocation4 + $0x164] ss:$16 sps:$4 sm:$0xff]   ;;  %v3329_v15 = vld [vmem:[#allocation4 + $0x16c] ss:$16 sps:$4 sm:$0xff]  }
  0x64   :  { %316 = vmatpush1.bf16.msra.mxu0 %v3230_v21  ;;  %357 = vmatpush1.bf16.msra.mxu1 %v3254_v34  ;;  %v3324_v16 = vld [vmem:[#allocation4 + $0x160] ss:$16 sps:$4 sm:$0xff]   ;;  %v3327_v17 = vld [vmem:[#allocation4 + $0x168] ss:$16 sps:$4 sm:$0xff]   ;;  %v3332_v18 = vld [vmem:[#allocation4 + $0x184] ss:$16 sps:$4 sm:$0xff]  }
  0x65   :  { %317 = vmatprep.subr.bf16.mxu0 %v3231_v24  ;;  %358 = vmatprep.subr.bf16.mxu1 %v3255_v35  ;;  %v3335_v19 = vld [vmem:[#allocation4 + $0x18c] ss:$16 sps:$4 sm:$0xff]   ;;  %v3330_v20 = vld [vmem:[#allocation4 + $0x180] ss:$16 sps:$4 sm:$0xff]   ;;  %v3333_v21 = vld [vmem:[#allocation4 + $0x188] ss:$16 sps:$4 sm:$0xff]  }
  0x66   :  { %v3338_v22 = vld [vmem:[#allocation4 + $0x1a4] ss:$16 sps:$4 sm:$0xff]   ;;  %v3341_v23 = vld [vmem:[#allocation4 + $0x1ac] ss:$16 sps:$4 sm:$0xff]   ;;  %v3336_v24 = vld [vmem:[#allocation4 + $0x1a0] ss:$16 sps:$4 sm:$0xff]  }
  0x67   :  { %v3344_v26 = vld [vmem:[#allocation4 + $0x1c4] ss:$16 sps:$4 sm:$0xff]   ;;  %v3347_v27 = vld [vmem:[#allocation4 + $0x1cc] ss:$16 sps:$4 sm:$0xff]  }
  0x68   :  { %318 = vmatpush1.bf16.msra.mxu0 %v3233_v25  ;;  %359 = vmatpush1.bf16.msra.mxu1 %v3257_v38  ;;  %v3339_v25 = vld [vmem:[#allocation4 + $0x1a8] ss:$16 sps:$4 sm:$0xff]   ;;  %v3350_v30 = vld [vmem:[#allocation4 + $0x1e4] ss:$16 sps:$4 sm:$0xff]   ;;  %v3353_v31 = vld [vmem:[#allocation4 + $0x1ec] ss:$16 sps:$4 sm:$0xff]  }
  0x69   :  { %1231 = vmatprep.subr.bf16.mxu0 %v3260_v28  ;;  %1313 = vmatprep.subr.bf16.mxu1 %v3263_v39  ;;  %v3342_v28 = vld [vmem:[#allocation4 + $0x1c0] ss:$16 sps:$4 sm:$0xff]   ;;  %v3356_v34 = vld [vmem:[#allocation4 + $0x204] ss:$16 sps:$4 sm:$0xff]   ;;  %v3359_v35 = vld [vmem:[#allocation4 + $0x20c] ss:$16 sps:$4 sm:$0xff]  }
  0x6a   :  { %v3957_v39 = vld [vmem:[%s4047_s2] sm:$0xf] }
  0x6b   :  { %336 = vmatmul.mubr.bf16.vlgmr.msra.gmra.mrb[0].mxu0 %v88_v29  ;;  %377 = vmatmul.mubr.bf16.vlgmr.msra.gmra.mrb[0].mxu1 %v88_v29  ;;  %v3345_v29 = vld [vmem:[#allocation4 + $0x1c8] ss:$16 sps:$4 sm:$0xff]  }
  0x6c   :  { %1232 = vmatpush1.bf16.msra.mxu0 %v3258_v32  ;;  %1314 = vmatpush1.bf16.msra.mxu1 %v3261_v41  ;;  %v3348_v32 = vld [vmem:[#allocation4 + $0x1e0] ss:$16 sps:$4 sm:$0xff]  }
  0x6d   :  { %1233 = vmatprep.subr.bf16.mxu0 %v3266_v33  ;;  %1315 = vmatprep.subr.bf16.mxu1 %v3269_v43  ;;  %v3351_v33 = vld [vmem:[#allocation4 + $0x1e8] ss:$16 sps:$4 sm:$0xff]  }
  0x70   :  { %1234 = vmatpush1.bf16.msra.mxu0 %v3264_v36  ;;  %1316 = vmatpush1.bf16.msra.mxu1 %v3267_v46  ;;  %v123_v36 = vlaneseq }
  0x71   :  { %1235 = vmatprep.subr.bf16.mxu0 %v3272_v37  ;;  %1317 = vmatprep.subr.bf16.mxu1 %v3275_v47 }
  0x72   :  { %v3949_v37 = vshrl.u32 %v123_v36, 7  ;;  %v3374_v36 = vld [vmem:[#allocation4 + $0x264] ss:$16 sps:$4 sm:$0xff]  }
  0x74   :  { %1236 = vmatpush1.bf16.msra.mxu0 %v3270_v40  ;;  %1318 = vmatpush1.bf16.msra.mxu1 %v3273_v50  ;;  %v3952_v38 = vsub.s32 0, %v3949_v37  ;;  %v3960_v40 = vsub.s32 1, %v3949_v37 }
  0x75   :  { %1237 = vmatprep.subr.bf16.mxu0 %v3278_v42  ;;  %1319 = vmatprep.subr.bf16.mxu1 %v3281_v51  ;;  %v3967_v51 = vsub.s32 3, %v3949_v37 }
  0x76   :  { %v126_v41 = vrot.slane %v3957_v39, %v3952_v38  ;;  %v130_v42 = vrot.slane %v3957_v39, %v3960_v40 }
  0x78   :  { %1238 = vmatpush1.bf16.msra.mxu0 %v3276_v44  ;;  %1320 = vmatpush1.bf16.msra.mxu1 %v3279_v54 }
  0x79   :  { %1239 = vmatprep.subr.bf16.mxu0 %v3284_v45  ;;  %1321 = vmatprep.subr.bf16.mxu1 %v3287_v55 }
  0x7c   :  { %1240 = vmatpush1.bf16.msra.mxu0 %v3282_v48  ;;  %1322 = vmatpush1.bf16.msra.mxu1 %v3285_v57 }
  0x7d   :  { %1241 = vmatprep.subr.bf16.mxu0 %v3290_v49  ;;  %1323 = vmatprep.subr.bf16.mxu1 %v3293_v58 }
  0x80   :  { %1242 = vmatpush1.bf16.msra.mxu0 %v3288_v52  ;;  %1324 = vmatpush1.bf16.msra.mxu1 %v3291_v59  ;;  %v138_v52 = vrot.slane %v3957_v39, %v3967_v51 }
  0x81   :  { %1243 = vmatprep.subr.bf16.mxu0 %v3296_v53  ;;  %1325 = vmatprep.subr.bf16.mxu1 %v3299_v60 }
  0x84   :  { %1244 = vmatpush1.bf16.msra.mxu0 %v3294_v56  ;;  %1326 = vmatpush1.bf16.msra.mxu1 %v3297_v61 }
  0x85   :  { %1245 = vmatprep.subr.bf16.mxu0 %v3302_v62  ;;  %1327 = vmatprep.subr.bf16.mxu1 %v3305_v63 }
  0x88   :  { %1246 = vmatpush1.bf16.msra.mxu0 %v3300_v0  ;;  %1328 = vmatpush1.bf16.msra.mxu1 %v3303_v1 }
  0x89   :  { %1247 = vmatprep.subr.bf16.mxu0 %v3308_v2  ;;  %1329 = vmatprep.subr.bf16.mxu1 %v3311_v3 }
  0x8c   :  { %1248 = vmatpush1.bf16.msra.mxu0 %v3306_v4  ;;  %1330 = vmatpush1.bf16.msra.mxu1 %v3309_v5 }
  0x8d   :  { %1249 = vmatprep.subr.bf16.mxu0 %v3314_v6  ;;  %1331 = vmatprep.subr.bf16.mxu1 %v3317_v7 }
  0x90   :  { %1250 = vmatpush1.bf16.msra.mxu0 %v3312_v8  ;;  %1332 = vmatpush1.bf16.msra.mxu1 %v3315_v9 }
  0x91   :  { %1251 = vmatprep.subr.bf16.mxu0 %v3320_v10  ;;  %1333 = vmatprep.subr.bf16.mxu1 %v3323_v11 }
  0x94   :  { %1252 = vmatpush1.bf16.msra.mxu0 %v3318_v12  ;;  %1334 = vmatpush1.bf16.msra.mxu1 %v3321_v13 }
  0x95   :  { %1253 = vmatprep.subr.bf16.mxu0 %v3326_v14  ;;  %1335 = vmatprep.subr.bf16.mxu1 %v3329_v15 }
  0x98   :  { %1254 = vmatpush1.bf16.msra.mxu0 %v3324_v16  ;;  %1336 = vmatpush1.bf16.msra.mxu1 %v3327_v17 }
  0x99   :  { %1255 = vmatprep.subr.bf16.mxu0 %v3332_v18  ;;  %1337 = vmatprep.subr.bf16.mxu1 %v3335_v19  ;;  %v3354_v19 = vld [vmem:[#allocation4 + $0x200] ss:$16 sps:$4 sm:$0xff]  }
  0x9c   :  { %1256 = vmatpush1.bf16.msra.mxu0 %v3330_v20  ;;  %1338 = vmatpush1.bf16.msra.mxu1 %v3333_v21  ;;  %v3357_v20 = vld [vmem:[#allocation4 + $0x208] ss:$16 sps:$4 sm:$0xff]  }
  0x9d   :  { %1257 = vmatprep.subr.bf16.mxu0 %v3338_v22  ;;  %1339 = vmatprep.subr.bf16.mxu1 %v3341_v23  ;;  %v3362_v22 = vld [vmem:[#allocation4 + $0x224] ss:$16 sps:$4 sm:$0xff]   ;;  %v3365_v23 = vld [vmem:[#allocation4 + $0x22c] ss:$16 sps:$4 sm:$0xff]  }
  0xa0   :  { %1258 = vmatpush1.bf16.msra.mxu0 %v3336_v24  ;;  %1340 = vmatpush1.bf16.msra.mxu1 %v3339_v25 }
  0xa1   :  { %1259 = vmatprep.subr.bf16.mxu0 %v3344_v26  ;;  %1341 = vmatprep.subr.bf16.mxu1 %v3347_v27  ;;  %v3360_v26 = vld [vmem:[#allocation4 + $0x220] ss:$16 sps:$4 sm:$0xff]   ;;  %v3363_v27 = vld [vmem:[#allocation4 + $0x228] ss:$16 sps:$4 sm:$0xff]  }
  0xa4   :  { %1260 = vmatpush1.bf16.msra.mxu0 %v3342_v28  ;;  %1342 = vmatpush1.bf16.msra.mxu1 %v3345_v29  ;;  %v3368_v28 = vld [vmem:[#allocation4 + $0x244] ss:$16 sps:$4 sm:$0xff]   ;;  %v3371_v29 = vld [vmem:[#allocation4 + $0x24c] ss:$16 sps:$4 sm:$0xff]  }
  0xa5   :  { %1261 = vmatprep.subr.bf16.mxu0 %v3350_v30  ;;  %1343 = vmatprep.subr.bf16.mxu1 %v3353_v31 }
  0xa8   :  { %1262 = vmatpush1.bf16.msra.mxu0 %v3348_v32  ;;  %1344 = vmatpush1.bf16.msra.mxu1 %v3351_v33  ;;  %v3366_v33 = vld [vmem:[#allocation4 + $0x240] ss:$16 sps:$4 sm:$0xff]  }
  0xa9   :  { %1272 = vmatprep.subr.bf16.mxu0 %v3356_v34  ;;  %1354 = vmatprep.subr.bf16.mxu1 %v3359_v35  ;;  %v3369_v34 = vld [vmem:[#allocation4 + $0x248] ss:$16 sps:$4 sm:$0xff]   ;;  %v3978_v35 = vsub.s32 2, %v3949_v37  ;;  %v3383_v37 = vld [vmem:[#allocation4 + $0x28c] ss:$16 sps:$4 sm:$0xff]  }
 0x13e   :  { %v337_v43 = vpop.f32.mrb[0].mxu0  ;;  %v3971_v53 = vpop.f32.mrb[0].mxu1 }
 0x13f   :  { %v338_v44 = vadd.f32 %v337_v43, %v126_v41  ;;  %v339_v45 = vpop.f32.mrb[1].mxu0  ;;  %v380_v54 = vpop.f32.mrb[1].mxu1  ;;  %v3377_v41 = vld [vmem:[#allocation4 + $0x26c] ss:$16 sps:$4 sm:$0xff]  }
 0x140   :  { %v340_v46 = vadd.f32 %v339_v45, %v130_v42  ;;  %v341_v47 = vpop.f32.mrb[2].mxu0  ;;  %v3973_v55 = vadd.f32 %v380_v54, %v138_v52  ;;  %v382_v56 = vpop.f32.mrb[2].mxu1  ;;  %v3372_v45 = vld [vmem:[#allocation4 + $0x260] ss:$16 sps:$4 sm:$0xff]   ;;  %v3386_v54 = vld [vmem:[#allocation4 + $0x2a4] ss:$16 sps:$4 sm:$0xff]  }
 0x141   :  { %v389_v48 = vmul.f32 1.442695, %v338_v44  ;;  %v342_v49 = vpop.f32.mrb[3].mxu0  ;;  %v383_v57 = vpop.f32.mrb[3].mxu1  ;;  %vm385_vm1 = vcmp.gt.f32.partialorder %v338_v44, 20.0  ;;  %v134_v47 = vrot.slane %v3957_v39, %v3978_v35 }
 0x142   :  { %v391_v50 = vmul.f32 1.442695, %v340_v46  ;;  %v395_v59 = vmul.f32 1.442695, %v3973_v55  ;;  %vm386_vm3 = vcmp.gt.f32.partialorder %v340_v46, 20.0  ;;  %vm388_vm5 = vcmp.gt.f32.partialorder %v3973_v55, 20.0 }
 0x143   :  { %3674 = vpow2.f32 %v389_v48  ;;  %v3380_v48 = vld [vmem:[#allocation4 + $0x284] ss:$16 sps:$4 sm:$0xff]   ;;  %v3378_v49 = vld [vmem:[#allocation4 + $0x280] ss:$16 sps:$4 sm:$0xff]   ;;  %v3984_v52 = vadd.f32 %v3971_v53, %v134_v47  ;;  %v3387_v56 = vld [vmem:[#allocation4 + $0x2a8] ss:$16 sps:$4 sm:$0xff]  }
 0x144   :  { %3676 = vpow2.f32 %v391_v50  ;;  %v3381_v50 = vld [vmem:[#allocation4 + $0x288] ss:$16 sps:$4 sm:$0xff]   ;;  %v3384_v39 = vld [vmem:[#allocation4 + $0x2a0] ss:$16 sps:$4 sm:$0xff]   ;;  %v3398_v53 = vld [vmem:[#allocation4 + $0x2e4] ss:$16 sps:$4 sm:$0xff]  }
 0x145   :  { %3678 = vpow2.f32 %v395_v59  ;;  %v393_v57 = vmul.f32 1.442695, %v3984_v52  ;;  %v3395_v59 = vld [vmem:[#allocation4 + $0x2cc] ss:$16 sps:$4 sm:$0xff]   ;;  %vm387_vm7 = vcmp.gt.f32.partialorder %v3984_v52, 20.0 }
 0x146   :  { %v3447_v47 = vld [vmem:[#allocation4 + $0x3e8] ss:$16 sps:$4 sm:$0xff]  }
 0x14d   :  { %v3675_v58 = vpop.eup %3674 }
 0x14e   :  { %v3677_v60 = vpop.eup %3676  ;;  %v397_v61 = vadd.f32 1.0, %v3675_v58  ;;  %v400_v63 = vmul.f32 -0.5, %v3675_v58  ;;  %v403_v2 = vand.u32 2147483647, %v3675_v58 }
 0x14f   :  { %v406_v62 = vadd.f32 1.0, %v3677_v60  ;;  %v409_v0 = vmul.f32 -0.5, %v3677_v60  ;;  %v3679_v4 = vpop.eup %3678  ;;  %v412_v5 = vand.u32 2147483647, %v3677_v60 }
 0x150   :  { %3680 = vlog2.f32 %v397_v61  ;;  %v401_v1 = vadd.f32 1.0, %v400_v63  ;;  %v424_v7 = vadd.f32 1.0, %v3679_v4  ;;  %vm404_vm0 = vcmp.lt.f32.partialorder %v403_v2, 0.0004427343  ;;  %v3393_v61 = vld [vmem:[#allocation4 + $0x2c8] ss:$16 sps:$4 sm:$0xff]  }
 0x151   :  { %3682 = vlog2.f32 %v406_v62  ;;  %v410_v3 = vadd.f32 1.0, %v409_v0  ;;  %vm413_vm2 = vcmp.lt.f32.partialorder %v412_v5, 0.0004427343  ;;  %v427_v14 = vmul.f32 -0.5, %v3679_v4  ;;  %v3401_v62 = vld [vmem:[#allocation4 + $0x2ec] ss:$16 sps:$4 sm:$0xff]  }
 0x152   :  { %v402_v10 = vmul.f32 %v3675_v58, %v401_v1  ;;  %3684 = vlog2.f32 %v424_v7  ;;  %v430_v25 = vand.u32 2147483647, %v3679_v4  ;;  %v3392_v58 = vld [vmem:[#allocation4 + $0x2c4] ss:$16 sps:$4 sm:$0xff]   ;;  %v3396_v63 = vld [vmem:[#allocation4 + $0x2e0] ss:$16 sps:$4 sm:$0xff]  }
 0x153   :  { %v411_v12 = vmul.f32 %v3677_v60, %v410_v3  ;;  %v428_v24 = vadd.f32 1.0, %v427_v14  ;;  %v3390_v60 = vld [vmem:[#allocation4 + $0x2c0] ss:$16 sps:$4 sm:$0xff]   ;;  %3686 = vpow2.f32 %v393_v57  ;;  %v3399_v0 = vld [vmem:[#allocation4 + $0x2e8] ss:$16 sps:$4 sm:$0xff]  }
 0x154   :  { %vm431_vm4 = vcmp.lt.f32.partialorder %v430_v25, 0.0004427343  ;;  %v3404_v1 = vld [vmem:[#allocation4 + $0x304] ss:$16 sps:$4 sm:$0xff]   ;;  %v3407_v2 = vld [vmem:[#allocation4 + $0x30c] ss:$16 sps:$4 sm:$0xff]  }
 0x155   :  { %v429_v30 = vmul.f32 %v3679_v4, %v428_v24  ;;  %v3402_v3 = vld [vmem:[#allocation4 + $0x300] ss:$16 sps:$4 sm:$0xff]   ;;  %v3405_v4 = vld [vmem:[#allocation4 + $0x308] ss:$16 sps:$4 sm:$0xff]   ;;  %v3410_v5 = vld [vmem:[#allocation4 + $0x324] ss:$16 sps:$4 sm:$0xff]  }
 0x156   :  { %v3417_v14 = vld [vmem:[#allocation4 + $0x348] ss:$16 sps:$4 sm:$0xff]   ;;  %v3434_v24 = vld [vmem:[#allocation4 + $0x3a4] ss:$16 sps:$4 sm:$0xff]   ;;  %v3437_v25 = vld [vmem:[#allocation4 + $0x3ac] ss:$16 sps:$4 sm:$0xff]  }
 0x157   :  { %v3456_v57 = vld [vmem:[#allocation6 + $0x20] ss:$16 sps:$4 sm:$0xff]  }
 0x15a   :  { %v3681_v6 = vpop.eup %3680 }
 0x15b   :  { %v3683_v8 = vpop.eup %3682  ;;  %v399_v9 = vmul.f32 0.6931472, %v3681_v6  ;;  %v3413_v6 = vld [vmem:[#allocation4 + $0x32c] ss:$16 sps:$4 sm:$0xff]  }
 0x15c   :  { %v408_v11 = vmul.f32 0.6931472, %v3683_v8  ;;  %v3685_v31 = vpop.eup %3684  ;;  %v3408_v8 = vld [vmem:[#allocation4 + $0x320] ss:$16 sps:$4 sm:$0xff]  }
 0x15d   :  { %v405_v13 = vsel %vm404_vm0, %v402_v10, %v399_v9  ;;  %v426_v32 = vmul.f32 0.6931472, %v3685_v31  ;;  %v3687_v7 = vpop.eup %3686  ;;  %v3411_v9 = vld [vmem:[#allocation4 + $0x328] ss:$16 sps:$4 sm:$0xff]   ;;  %v3416_v10 = vld [vmem:[#allocation4 + $0x344] ss:$16 sps:$4 sm:$0xff]  }
 0x15e   :  { %v433_v15 = vsel %vm385_vm1, %v338_v44, %v405_v13  ;;  %v414_v16 = vsel %vm413_vm2, %v411_v12, %v408_v11  ;;  %v3419_v11 = vld [vmem:[#allocation4 + $0x34c] ss:$16 sps:$4 sm:$0xff]   ;;  %v415_v12 = vadd.f32 1.0, %v3687_v7  ;;  %v3414_v13 = vld [vmem:[#allocation4 + $0x340] ss:$16 sps:$4 sm:$0xff]  }
 0x15f   :  { %v434_v17 = vsel %vm386_vm3, %v340_v46, %v414_v16  ;;  %v437_v21 = vpack.c.bf16 %v433_v15, %v433_v15  ;;  %v432_v42 = vsel %vm431_vm4, %v429_v30, %v426_v32  ;;  %v3375_v46 = vld [vmem:[#allocation4 + $0x268] ss:$16 sps:$4 sm:$0xff]   ;;  %v3422_v15 = vld [vmem:[#allocation4 + $0x364] ss:$16 sps:$4 sm:$0xff]   ;;  %v3425_v16 = vld [vmem:[#allocation4 + $0x36c] ss:$16 sps:$4 sm:$0xff]  }
 0x160   :  { %v438_v18 = vpack.c.bf16 %v434_v17, %v434_v17  ;;  %v436_v43 = vsel %vm388_vm5, %v3973_v55, %v432_v42  ;;  %v3389_v55 = vld [vmem:[#allocation4 + $0x2ac] ss:$16 sps:$4 sm:$0xff]   ;;  %3688 = vlog2.f32 %v415_v12  ;;  %v3420_v17 = vld [vmem:[#allocation4 + $0x360] ss:$16 sps:$4 sm:$0xff]   ;;  %v3435_v30 = vld [vmem:[#allocation4 + $0x3a8] ss:$16 sps:$4 sm:$0xff]  }
 0x161   :  { %v440_v44 = vpack.c.bf16 %v436_v43, %v436_v43  ;;  %v3440_v31 = vld [vmem:[#allocation4 + $0x3c4] ss:$16 sps:$4 sm:$0xff]   ;;  %v3443_v32 = vld [vmem:[#allocation4 + $0x3cc] ss:$16 sps:$4 sm:$0xff]   ;;  %v3441_v42 = vld [vmem:[#allocation4 + $0x3c8] ss:$16 sps:$4 sm:$0xff]  }
 0x162   :  { %1263 = vmatprep.mubr.bf16.mxu0 %v438_v18  ;;  %1345 = vmatprep.mubr.bf16.mxu1 %v438_v18  ;;  %v3423_v18 = vld [vmem:[#allocation4 + $0x368] ss:$16 sps:$4 sm:$0xff]   ;;  %v3446_v43 = vld [vmem:[#allocation4 + $0x3e4] ss:$16 sps:$4 sm:$0xff]  }
 0x163   :  { %1264 = vmatmul.mubr.bf16.vlgmr.msra.gmra.mrb[4].mxu0 %v437_v21  ;;  %1346 = vmatmul.mubr.bf16.vlgmr.msra.gmra.mrb[4].mxu1 %v437_v21  ;;  %v418_v21 = vmul.f32 -0.5, %v3687_v7  ;;  %v3489_v12 = vld [vmem:[#allocation6 + $0xc8] ss:$16 sps:$4 sm:$0xff]  }
 0x164   :  { %1273 = vmatpush1.bf16.msra.mxu0 %v3354_v19  ;;  %1355 = vmatpush1.bf16.msra.mxu1 %v3357_v20  ;;  %v3428_v19 = vld [vmem:[#allocation4 + $0x384] ss:$16 sps:$4 sm:$0xff]   ;;  %v3431_v20 = vld [vmem:[#allocation4 + $0x38c] ss:$16 sps:$4 sm:$0xff]  }
 0x165   :  { %1274 = vmatprep.subr.bf16.mxu0 %v3362_v22  ;;  %1356 = vmatprep.subr.bf16.mxu1 %v3365_v23  ;;  %v3426_v22 = vld [vmem:[#allocation4 + $0x380] ss:$16 sps:$4 sm:$0xff]   ;;  %v3429_v23 = vld [vmem:[#allocation4 + $0x388] ss:$16 sps:$4 sm:$0xff]  }
 0x166   :  { %1304 = vmatprep.mubr.bf16.mxu0 %v440_v44  ;;  %1386 = vmatprep.mubr.bf16.mxu1 %v440_v44  ;;  %v3449_v44 = vld [vmem:[#allocation4 + $0x3ec] ss:$16 sps:$4 sm:$0xff]  }
 0x168   :  { %1275 = vmatpush1.bf16.msra.mxu0 %v3360_v26  ;;  %1357 = vmatpush1.bf16.msra.mxu1 %v3363_v27  ;;  %v419_v26 = vadd.f32 1.0, %v418_v21  ;;  %v3506_v21 = vld [vmem:[#allocation6 + $0x124] ss:$16 sps:$4 sm:$0xff]  }
 0x169   :  { %1276 = vmatprep.subr.bf16.mxu0 %v3368_v28  ;;  %1358 = vmatprep.subr.bf16.mxu1 %v3371_v29  ;;  %v421_v28 = vand.u32 2147483647, %v3687_v7  ;;  %v3432_v29 = vld [vmem:[#allocation4 + $0x3a0] ss:$16 sps:$4 sm:$0xff]  }
 0x16a   :  { %v3689_v27 = vpop.eup %3688 }
 0x16b   :  { %vm3987_vm6 = vcmp.lt.f32.partialorder %v421_v28, 0.0004427343  ;;  %v3513_v28 = vld [vmem:[#allocation6 + $0x148] ss:$16 sps:$4 sm:$0xff]  }
 0x16c   :  { %1277 = vmatpush1.bf16.msra.mxu0 %v3366_v33  ;;  %1359 = vmatpush1.bf16.msra.mxu1 %v3369_v34  ;;  %v417_v33 = vmul.f32 0.6931472, %v3689_v27  ;;  %v420_v34 = vmul.f32 %v3687_v7, %v419_v26  ;;  %v3480_v7 = vld [vmem:[#allocation6 + $0xa0] ss:$16 sps:$4 sm:$0xff]   ;;  %v3515_v26 = vld [vmem:[#allocation6 + $0x14c] ss:$16 sps:$4 sm:$0xff]  }
 0x16d   :  { %1278 = vmatprep.subr.bf16.mxu0 %v3374_v36  ;;  %1360 = vmatprep.subr.bf16.mxu1 %v3377_v41  ;;  %v3438_v41 = vld [vmem:[#allocation4 + $0x3c0] ss:$16 sps:$4 sm:$0xff]  }
 0x16e   :  { %v3510_v27 = vld [vmem:[#allocation6 + $0x140] ss:$16 sps:$4 sm:$0xff]  }
 0x16f   :  { %v3522_v36 = vld [vmem:[#allocation6 + $0x180] ss:$16 sps:$4 sm:$0xff]  }
 0x170   :  { %1279 = vmatpush1.bf16.msra.mxu0 %v3372_v45  ;;  %1361 = vmatpush1.bf16.msra.mxu1 %v3375_v46  ;;  %v423_v45 = vsel %vm3987_vm6, %v420_v34, %v417_v33  ;;  %v3444_v46 = vld [vmem:[#allocation4 + $0x3e0] ss:$16 sps:$4 sm:$0xff]   ;;  %v3524_v33 = vld [vmem:[#allocation6 + $0x184] ss:$16 sps:$4 sm:$0xff]   ;;  %v3527_v34 = vld [vmem:[#allocation6 + $0x18c] ss:$16 sps:$4 sm:$0xff]  }
 0x171   :  { %1280 = vmatprep.subr.bf16.mxu0 %v3380_v48  ;;  %1362 = vmatprep.subr.bf16.mxu1 %v3383_v37  ;;  %v3452_v48 = vld [vmem:[#allocation6 + $0x4] ss:$16 sps:$4 sm:$0xff]   ;;  %v3455_v37 = vld [vmem:[#allocation6 + $0xc] ss:$16 sps:$4 sm:$0xff]  }
 0x174   :  { %1281 = vmatpush1.bf16.msra.mxu0 %v3378_v49  ;;  %1363 = vmatpush1.bf16.msra.mxu1 %v3381_v50  ;;  %v435_v49 = vsel %vm387_vm7, %v3984_v52, %v423_v45  ;;  %v3450_v50 = vld [vmem:[#allocation6] ss:$16 sps:$4 sm:$0xff]   ;;  %v3531_v45 = vld [vmem:[#allocation6 + $0x1a8] ss:$16 sps:$4 sm:$0xff]  }
 0x175   :  { %1282 = vmatprep.subr.bf16.mxu0 %v3386_v54  ;;  %1364 = vmatprep.subr.bf16.mxu1 %v3389_v55  ;;  %v3453_v54 = vld [vmem:[#allocation6 + $0x8] ss:$16 sps:$4 sm:$0xff]   ;;  %v439_v55 = vpack.c.bf16 %v435_v49, %v435_v49  ;;  %v3462_v52 = vld [vmem:[#allocation6 + $0x40] ss:$16 sps:$4 sm:$0xff]   ;;  %v3542_v49 = vld [vmem:[#allocation6 + $0x1e4] ss:$16 sps:$4 sm:$0xff]  }
 0x178   :  { %1283 = vmatpush1.bf16.msra.mxu0 %v3384_v39  ;;  %1365 = vmatpush1.bf16.msra.mxu1 %v3387_v56  ;;  %v3458_v39 = vld [vmem:[#allocation6 + $0x24] ss:$16 sps:$4 sm:$0xff]   ;;  %v3461_v56 = vld [vmem:[#allocation6 + $0x2c] ss:$16 sps:$4 sm:$0xff]  }
 0x179   :  { %1284 = vmatprep.subr.bf16.mxu0 %v3392_v58  ;;  %1366 = vmatprep.subr.bf16.mxu1 %v3395_v59  ;;  %v3459_v58 = vld [vmem:[#allocation6 + $0x28] ss:$16 sps:$4 sm:$0xff]   ;;  %v3464_v59 = vld [vmem:[#allocation6 + $0x44] ss:$16 sps:$4 sm:$0xff]  }
 0x17c   :  { %1285 = vmatpush1.bf16.msra.mxu0 %v3390_v60  ;;  %1367 = vmatpush1.bf16.msra.mxu1 %v3393_v61  ;;  %v3467_v60 = vld [vmem:[#allocation6 + $0x4c] ss:$16 sps:$4 sm:$0xff]   ;;  %v3465_v61 = vld [vmem:[#allocation6 + $0x48] ss:$16 sps:$4 sm:$0xff]  }
 0x17d   :  { %1286 = vmatprep.subr.bf16.mxu0 %v3398_v53  ;;  %1368 = vmatprep.subr.bf16.mxu1 %v3401_v62  ;;  %v3470_v53 = vld [vmem:[#allocation6 + $0x64] ss:$16 sps:$4 sm:$0xff]   ;;  %v3473_v62 = vld [vmem:[#allocation6 + $0x6c] ss:$16 sps:$4 sm:$0xff]  }
 0x180   :  { %1287 = vmatpush1.bf16.msra.mxu0 %v3396_v63  ;;  %1369 = vmatpush1.bf16.msra.mxu1 %v3399_v0  ;;  %v3468_v63 = vld [vmem:[#allocation6 + $0x60] ss:$16 sps:$4 sm:$0xff]   ;;  %v3471_v0 = vld [vmem:[#allocation6 + $0x68] ss:$16 sps:$4 sm:$0xff]  }
 0x181   :  { %1288 = vmatprep.subr.bf16.mxu0 %v3404_v1  ;;  %1370 = vmatprep.subr.bf16.mxu1 %v3407_v2  ;;  %v3476_v1 = vld [vmem:[#allocation6 + $0x84] ss:$16 sps:$4 sm:$0xff]   ;;  %v3479_v2 = vld [vmem:[#allocation6 + $0x8c] ss:$16 sps:$4 sm:$0xff]  }
 0x184   :  { %1289 = vmatpush1.bf16.msra.mxu0 %v3402_v3  ;;  %1371 = vmatpush1.bf16.msra.mxu1 %v3405_v4  ;;  %v3474_v3 = vld [vmem:[#allocation6 + $0x80] ss:$16 sps:$4 sm:$0xff]   ;;  %v3477_v4 = vld [vmem:[#allocation6 + $0x88] ss:$16 sps:$4 sm:$0xff]  }
 0x185   :  { %1290 = vmatprep.subr.bf16.mxu0 %v3410_v5  ;;  %1372 = vmatprep.subr.bf16.mxu1 %v3413_v6  ;;  %v3482_v5 = vld [vmem:[#allocation6 + $0xa4] ss:$16 sps:$4 sm:$0xff]   ;;  %v3485_v6 = vld [vmem:[#allocation6 + $0xac] ss:$16 sps:$4 sm:$0xff]  }
 0x188   :  { %1291 = vmatpush1.bf16.msra.mxu0 %v3408_v8  ;;  %1373 = vmatpush1.bf16.msra.mxu1 %v3411_v9  ;;  %v3483_v8 = vld [vmem:[#allocation6 + $0xa8] ss:$16 sps:$4 sm:$0xff]   ;;  %v3488_v9 = vld [vmem:[#allocation6 + $0xc4] ss:$16 sps:$4 sm:$0xff]  }
 0x189   :  { %1292 = vmatprep.subr.bf16.mxu0 %v3416_v10  ;;  %1374 = vmatprep.subr.bf16.mxu1 %v3419_v11  ;;  %v3491_v10 = vld [vmem:[#allocation6 + $0xcc] ss:$16 sps:$4 sm:$0xff]   ;;  %v3486_v11 = vld [vmem:[#allocation6 + $0xc0] ss:$16 sps:$4 sm:$0xff]  }
 0x18c   :  { %1293 = vmatpush1.bf16.msra.mxu0 %v3414_v13  ;;  %1375 = vmatpush1.bf16.msra.mxu1 %v3417_v14  ;;  %v3494_v13 = vld [vmem:[#allocation6 + $0xe4] ss:$16 sps:$4 sm:$0xff]   ;;  %v3497_v14 = vld [vmem:[#allocation6 + $0xec] ss:$16 sps:$4 sm:$0xff]  }
 0x18d   :  { %1294 = vmatprep.subr.bf16.mxu0 %v3422_v15  ;;  %1376 = vmatprep.subr.bf16.mxu1 %v3425_v16  ;;  %v3492_v15 = vld [vmem:[#allocation6 + $0xe0] ss:$16 sps:$4 sm:$0xff]   ;;  %v3495_v16 = vld [vmem:[#allocation6 + $0xe8] ss:$16 sps:$4 sm:$0xff]  }
 0x190   :  { %1295 = vmatpush1.bf16.msra.mxu0 %v3420_v17  ;;  %1377 = vmatpush1.bf16.msra.mxu1 %v3423_v18  ;;  %v3500_v17 = vld [vmem:[#allocation6 + $0x104] ss:$16 sps:$4 sm:$0xff]   ;;  %v3503_v18 = vld [vmem:[#allocation6 + $0x10c] ss:$16 sps:$4 sm:$0xff]  }
 0x191   :  { %1296 = vmatprep.subr.bf16.mxu0 %v3428_v19  ;;  %1378 = vmatprep.subr.bf16.mxu1 %v3431_v20  ;;  %v3498_v19 = vld [vmem:[#allocation6 + $0x100] ss:$16 sps:$4 sm:$0xff]   ;;  %v3501_v20 = vld [vmem:[#allocation6 + $0x108] ss:$16 sps:$4 sm:$0xff]  }
 0x194   :  { %1297 = vmatpush1.bf16.msra.mxu0 %v3426_v22  ;;  %1379 = vmatpush1.bf16.msra.mxu1 %v3429_v23  ;;  %v3509_v22 = vld [vmem:[#allocation6 + $0x12c] ss:$16 sps:$4 sm:$0xff]   ;;  %v3504_v23 = vld [vmem:[#allocation6 + $0x120] ss:$16 sps:$4 sm:$0xff]  }
 0x195   :  { %1298 = vmatprep.subr.bf16.mxu0 %v3434_v24  ;;  %1380 = vmatprep.subr.bf16.mxu1 %v3437_v25  ;;  %v3507_v24 = vld [vmem:[#allocation6 + $0x128] ss:$16 sps:$4 sm:$0xff]   ;;  %v3512_v25 = vld [vmem:[#allocation6 + $0x144] ss:$16 sps:$4 sm:$0xff]  }
 0x198   :  { %1299 = vmatpush1.bf16.msra.mxu0 %v3432_v29  ;;  %1381 = vmatpush1.bf16.msra.mxu1 %v3435_v30  ;;  %v3518_v29 = vld [vmem:[#allocation6 + $0x164] ss:$16 sps:$4 sm:$0xff]   ;;  %v3521_v30 = vld [vmem:[#allocation6 + $0x16c] ss:$16 sps:$4 sm:$0xff]  }
 0x199   :  { %1300 = vmatprep.subr.bf16.mxu0 %v3440_v31  ;;  %1382 = vmatprep.subr.bf16.mxu1 %v3443_v32  ;;  %v3516_v31 = vld [vmem:[#allocation6 + $0x160] ss:$16 sps:$4 sm:$0xff]   ;;  %v3519_v32 = vld [vmem:[#allocation6 + $0x168] ss:$16 sps:$4 sm:$0xff]  }
 0x19c   :  { %1301 = vmatpush1.bf16.msra.mxu0 %v3438_v41  ;;  %1383 = vmatpush1.bf16.msra.mxu1 %v3441_v42  ;;  %v3525_v41 = vld [vmem:[#allocation6 + $0x188] ss:$16 sps:$4 sm:$0xff]   ;;  %v3530_v42 = vld [vmem:[#allocation6 + $0x1a4] ss:$16 sps:$4 sm:$0xff]  }
 0x19d   :  { %1302 = vmatprep.subr.bf16.mxu0 %v3446_v43  ;;  %1384 = vmatprep.subr.bf16.mxu1 %v3449_v44  ;;  %v3533_v43 = vld [vmem:[#allocation6 + $0x1ac] ss:$16 sps:$4 sm:$0xff]   ;;  %v3528_v44 = vld [vmem:[#allocation6 + $0x1a0] ss:$16 sps:$4 sm:$0xff]  }
 0x1a0   :  { %1303 = vmatpush1.bf16.msra.mxu0 %v3444_v46  ;;  %1385 = vmatpush1.bf16.msra.mxu1 %v3447_v47  ;;  %v3536_v46 = vld [vmem:[#allocation6 + $0x1c4] ss:$16 sps:$4 sm:$0xff]   ;;  %v3539_v47 = vld [vmem:[#allocation6 + $0x1cc] ss:$16 sps:$4 sm:$0xff]  }
 0x1a1   :  { %2241 = vmatprep.subr.bf16.mxu0 %v3452_v48  ;;  %2323 = vmatprep.subr.bf16.mxu1 %v3455_v37  ;;  %v3534_v48 = vld [vmem:[#allocation6 + $0x1c0] ss:$16 sps:$4 sm:$0xff]   ;;  %v3537_v37 = vld [vmem:[#allocation6 + $0x1c8] ss:$16 sps:$4 sm:$0xff]  }
 0x1a3   :  { %1305 = vmatmul.mubr.bf16.vlgmr.msra.gmra.mrb[4].mxu0 %v439_v55  ;;  %1387 = vmatmul.mubr.bf16.vlgmr.msra.gmra.mrb[4].mxu1 %v439_v55  ;;  %v3543_v55 = vld [vmem:[#allocation6 + $0x1e8] ss:$16 sps:$4 sm:$0xff]  }
 0x1a4   :  { %2242 = vmatpush1.bf16.msra.mxu0 %v3450_v50  ;;  %2324 = vmatpush1.bf16.msra.mxu1 %v3453_v54  ;;  %v3545_v50 = vld [vmem:[#allocation6 + $0x1ec] ss:$16 sps:$4 sm:$0xff]   ;;  %v3540_v54 = vld [vmem:[#allocation6 + $0x1e0] ss:$16 sps:$4 sm:$0xff]  }
 0x1a5   :  { %2243 = vmatprep.subr.bf16.mxu0 %v3458_v39  ;;  %2325 = vmatprep.subr.bf16.mxu1 %v3461_v56  ;;  %v3548_v39 = vld [vmem:[#allocation6 + $0x204] ss:$16 sps:$4 sm:$0xff]   ;;  %v3551_v56 = vld [vmem:[#allocation6 + $0x20c] ss:$16 sps:$4 sm:$0xff]  }
 0x1a8   :  { %2244 = vmatpush1.bf16.msra.mxu0 %v3456_v57  ;;  %2326 = vmatpush1.bf16.msra.mxu1 %v3459_v58  ;;  %v3998_v57 = vld [vmem:[%s4049_s4] sm:$0xf] }
 0x1a9   :  { %2245 = vmatprep.subr.bf16.mxu0 %v3464_v59  ;;  %2327 = vmatprep.subr.bf16.mxu1 %v3467_v60  ;;  %v574_v58 = vrot.slane %v3998_v57, %v3952_v38  ;;  %v578_v59 = vrot.slane %v3998_v57, %v3960_v40  ;;  %v586_v60 = vrot.slane %v3998_v57, %v3967_v51 }
 0x1ac   :  { %2246 = vmatpush1.bf16.msra.mxu0 %v3462_v52  ;;  %2328 = vmatpush1.bf16.msra.mxu1 %v3465_v61 }
 0x1ad   :  { %2247 = vmatprep.subr.bf16.mxu0 %v3470_v53  ;;  %2329 = vmatprep.subr.bf16.mxu1 %v3473_v62 }
 0x1b0   :  { %2248 = vmatpush1.bf16.msra.mxu0 %v3468_v63  ;;  %2330 = vmatpush1.bf16.msra.mxu1 %v3471_v0 }
 0x1b1   :  { %2249 = vmatprep.subr.bf16.mxu0 %v3476_v1  ;;  %2331 = vmatprep.subr.bf16.mxu1 %v3479_v2 }
 0x1b4   :  { %2250 = vmatpush1.bf16.msra.mxu0 %v3474_v3  ;;  %2332 = vmatpush1.bf16.msra.mxu1 %v3477_v4 }
 0x1b5   :  { %2251 = vmatprep.subr.bf16.mxu0 %v3482_v5  ;;  %2333 = vmatprep.subr.bf16.mxu1 %v3485_v6 }
 0x1b8   :  { %2252 = vmatpush1.bf16.msra.mxu0 %v3480_v7  ;;  %2334 = vmatpush1.bf16.msra.mxu1 %v3483_v8 }
 0x1b9   :  { %2253 = vmatprep.subr.bf16.mxu0 %v3488_v9  ;;  %2335 = vmatprep.subr.bf16.mxu1 %v3491_v10 }
 0x1bc   :  { %2254 = vmatpush1.bf16.msra.mxu0 %v3486_v11  ;;  %2336 = vmatpush1.bf16.msra.mxu1 %v3489_v12 }
 0x1bd   :  { %2255 = vmatprep.subr.bf16.mxu0 %v3494_v13  ;;  %2337 = vmatprep.subr.bf16.mxu1 %v3497_v14 }
 0x1c0   :  { %2256 = vmatpush1.bf16.msra.mxu0 %v3492_v15  ;;  %2338 = vmatpush1.bf16.msra.mxu1 %v3495_v16 }
 0x1c1   :  { %2257 = vmatprep.subr.bf16.mxu0 %v3500_v17  ;;  %2339 = vmatprep.subr.bf16.mxu1 %v3503_v18 }
 0x1c4   :  { %2258 = vmatpush1.bf16.msra.mxu0 %v3498_v19  ;;  %2340 = vmatpush1.bf16.msra.mxu1 %v3501_v20 }
 0x1c5   :  { %2259 = vmatprep.subr.bf16.mxu0 %v3506_v21  ;;  %2341 = vmatprep.subr.bf16.mxu1 %v3509_v22 }
 0x1c8   :  { %2260 = vmatpush1.bf16.msra.mxu0 %v3504_v23  ;;  %2342 = vmatpush1.bf16.msra.mxu1 %v3507_v24 }
 0x1c9   :  { %2261 = vmatprep.subr.bf16.mxu0 %v3512_v25  ;;  %2343 = vmatprep.subr.bf16.mxu1 %v3515_v26 }
 0x1cc   :  { %2262 = vmatpush1.bf16.msra.mxu0 %v3510_v27  ;;  %2344 = vmatpush1.bf16.msra.mxu1 %v3513_v28 }
 0x1cd   :  { %2263 = vmatprep.subr.bf16.mxu0 %v3518_v29  ;;  %2345 = vmatprep.subr.bf16.mxu1 %v3521_v30 }
 0x1d0   :  { %2264 = vmatpush1.bf16.msra.mxu0 %v3516_v31  ;;  %2346 = vmatpush1.bf16.msra.mxu1 %v3519_v32 }
 0x1d1   :  { %2265 = vmatprep.subr.bf16.mxu0 %v3524_v33  ;;  %2347 = vmatprep.subr.bf16.mxu1 %v3527_v34 }
 0x1d4   :  { %2266 = vmatpush1.bf16.msra.mxu0 %v3522_v36  ;;  %2348 = vmatpush1.bf16.msra.mxu1 %v3525_v41 }
 0x1d5   :  { %2267 = vmatprep.subr.bf16.mxu0 %v3530_v42  ;;  %2349 = vmatprep.subr.bf16.mxu1 %v3533_v43  ;;  %v3546_v43 = vld [vmem:[#allocation6 + $0x200] ss:$16 sps:$4 sm:$0xff]  }
 0x1d8   :  { %2268 = vmatpush1.bf16.msra.mxu0 %v3528_v44  ;;  %2350 = vmatpush1.bf16.msra.mxu1 %v3531_v45  ;;  %v3549_v44 = vld [vmem:[#allocation6 + $0x208] ss:$16 sps:$4 sm:$0xff]  }
 0x1d9   :  { %2269 = vmatprep.subr.bf16.mxu0 %v3536_v46  ;;  %2351 = vmatprep.subr.bf16.mxu1 %v3539_v47 }
 0x1dc   :  { %2270 = vmatpush1.bf16.msra.mxu0 %v3534_v48  ;;  %2352 = vmatpush1.bf16.msra.mxu1 %v3537_v37  ;;  %v3554_v48 = vld [vmem:[#allocation6 + $0x224] ss:$16 sps:$4 sm:$0xff]   ;;  %v3557_v37 = vld [vmem:[#allocation6 + $0x22c] ss:$16 sps:$4 sm:$0xff]  }
 0x1dd   :  { %2271 = vmatprep.subr.bf16.mxu0 %v3542_v49  ;;  %2353 = vmatprep.subr.bf16.mxu1 %v3545_v50  ;;  %v3552_v50 = vld [vmem:[#allocation6 + $0x220] ss:$16 sps:$4 sm:$0xff]  }
 0x1e0   :  { %2272 = vmatpush1.bf16.msra.mxu0 %v3540_v54  ;;  %2354 = vmatpush1.bf16.msra.mxu1 %v3543_v55  ;;  %v3555_v54 = vld [vmem:[#allocation6 + $0x228] ss:$16 sps:$4 sm:$0xff]   ;;  %v3560_v55 = vld [vmem:[#allocation6 + $0x244] ss:$16 sps:$4 sm:$0xff]  }
 0x1e1   :  { %2282 = vmatprep.subr.bf16.mxu0 %v3548_v39  ;;  %2364 = vmatprep.subr.bf16.mxu1 %v3551_v56  ;;  %v3563_v39 = vld [vmem:[#allocation6 + $0x24c] ss:$16 sps:$4 sm:$0xff]   ;;  %v3558_v56 = vld [vmem:[#allocation6 + $0x240] ss:$16 sps:$4 sm:$0xff]  }
 0x276   :  { %v1306_v52 = vpop.f32.mrb[4].mxu0  ;;  %v4006_v61 = vpop.f32.mrb[4].mxu1 }
 0x277   :  { %v3177_v53 = vadd.f32 %v1306_v52, %v574_v58  ;;  %v1308_v62 = vpop.f32.mrb[5].mxu0  ;;  %v1390_v63 = vpop.f32.mrb[5].mxu1  ;;  %v3561_v58 = vld [vmem:[#allocation6 + $0x248] ss:$16 sps:$4 sm:$0xff]   ;;  %v3564_v52 = vld [vmem:[#allocation6 + $0x260] ss:$16 sps:$4 sm:$0xff]  }
 0x278   :  { %v3178_v0 = vadd.f32 %v1308_v62, %v578_v59  ;;  %v3180_v1 = vadd.f32 %v1390_v63, %v586_v60  ;;  %v1310_v2 = vpop.f32.mrb[6].mxu0  ;;  %v1392_v3 = vpop.f32.mrb[6].mxu1  ;;  %v3566_v59 = vld [vmem:[#allocation6 + $0x264] ss:$16 sps:$4 sm:$0xff]   ;;  %v3569_v60 = vld [vmem:[#allocation6 + $0x26c] ss:$16 sps:$4 sm:$0xff]   ;;  %v582_v62 = vrot.slane %v3998_v57, %v3978_v35 }
 0x279   :  { %v1399_v4 = vmul.f32 1.442695, %v3177_v53  ;;  %v1311_v7 = vpop.f32.mrb[7].mxu0  ;;  %v1393_v8 = vpop.f32.mrb[7].mxu1  ;;  %vm1395_vm9 = vcmp.gt.f32.partialorder %v3177_v53, 20.0 }
 0x27a   :  { %v1401_v5 = vmul.f32 1.442695, %v3178_v0  ;;  %v1405_v6 = vmul.f32 1.442695, %v3180_v1  ;;  %vm1396_vm10 = vcmp.gt.f32.partialorder %v3178_v0, 20.0  ;;  %vm1398_vm13 = vcmp.gt.f32.partialorder %v3180_v1, 20.0 }
 0x27b   :  { %3690 = vpow2.f32 %v1399_v4  ;;  %v3572_v63 = vld [vmem:[#allocation6 + $0x284] ss:$16 sps:$4 sm:$0xff]   ;;  %v3573_v2 = vld [vmem:[#allocation6 + $0x288] ss:$16 sps:$4 sm:$0xff]   ;;  %v4011_v3 = vadd.f32 %v4006_v61, %v582_v62 }
 0x27c   :  { %3692 = vpow2.f32 %v1401_v5  ;;  %v3578_v4 = vld [vmem:[#allocation6 + $0x2a4] ss:$16 sps:$4 sm:$0xff]   ;;  %v3581_v5 = vld [vmem:[#allocation6 + $0x2ac] ss:$16 sps:$4 sm:$0xff]   ;;  %v3579_v7 = vld [vmem:[#allocation6 + $0x2a8] ss:$16 sps:$4 sm:$0xff]  }
 0x27d   :  { %3694 = vpow2.f32 %v1405_v6  ;;  %v3576_v6 = vld [vmem:[#allocation6 + $0x2a0] ss:$16 sps:$4 sm:$0xff]   ;;  %v1403_v57 = vmul.f32 1.442695, %v4011_v3  ;;  %v3584_v8 = vld [vmem:[#allocation6 + $0x2c4] ss:$16 sps:$4 sm:$0xff]  }
 0x27e   :  { %v3590_v61 = vld [vmem:[#allocation6 + $0x2e4] ss:$16 sps:$4 sm:$0xff]   ;;  %vm1397_vm15 = vcmp.gt.f32.partialorder %v4011_v3, 20.0 }
 0x285   :  { %v3691_v9 = vpop.eup %3690 }
 0x286   :  { %v1407_v10 = vadd.f32 1.0, %v3691_v9  ;;  %v3693_v11 = vpop.eup %3692  ;;  %v1410_v15 = vmul.f32 -0.5, %v3691_v9  ;;  %v1413_v19 = vand.u32 2147483647, %v3691_v9 }
 0x287   :  { %v3695_v12 = vpop.eup %3694  ;;  %v1416_v13 = vadd.f32 1.0, %v3693_v11  ;;  %v1419_v16 = vmul.f32 -0.5, %v3693_v11  ;;  %v1422_v22 = vand.u32 2147483647, %v3693_v11 }
 0x288   :  { %3696 = vlog2.f32 %v1407_v10  ;;  %v1434_v14 = vadd.f32 1.0, %v3695_v12  ;;  %v1411_v17 = vadd.f32 1.0, %v1410_v15  ;;  %v1437_v18 = vmul.f32 -0.5, %v3695_v12  ;;  %v3582_v10 = vld [vmem:[#allocation6 + $0x2c0] ss:$16 sps:$4 sm:$0xff]  }
 0x289   :  { %3698 = vlog2.f32 %v1416_v13  ;;  %v1420_v20 = vadd.f32 1.0, %v1419_v16  ;;  %vm1414_vm8 = vcmp.lt.f32.partialorder %v1413_v19, 0.0004427343  ;;  %v1440_v27 = vand.u32 2147483647, %v3695_v12 }
 0x28a   :  { %3700 = vlog2.f32 %v1434_v14  ;;  %v1412_v24 = vmul.f32 %v3691_v9, %v1411_v17  ;;  %v1438_v25 = vadd.f32 1.0, %v1437_v18  ;;  %vm1423_vm11 = vcmp.lt.f32.partialorder %v1422_v22, 0.0004427343  ;;  %v3587_v9 = vld [vmem:[#allocation6 + $0x2cc] ss:$16 sps:$4 sm:$0xff]  }
 0x28b   :  { %v1421_v30 = vmul.f32 %v3693_v11, %v1420_v20  ;;  %vm1441_vm12 = vcmp.lt.f32.partialorder %v1440_v27, 0.0004427343  ;;  %v3585_v11 = vld [vmem:[#allocation6 + $0x2c8] ss:$16 sps:$4 sm:$0xff]   ;;  %3702 = vpow2.f32 %v1403_v57  ;;  %v3588_v13 = vld [vmem:[#allocation6 + $0x2e0] ss:$16 sps:$4 sm:$0xff]  }
 0x28c   :  { %v1439_v36 = vmul.f32 %v3695_v12, %v1438_v25  ;;  %v3593_v12 = vld [vmem:[#allocation6 + $0x2ec] ss:$16 sps:$4 sm:$0xff]   ;;  %v3591_v14 = vld [vmem:[#allocation6 + $0x2e8] ss:$16 sps:$4 sm:$0xff]   ;;  %v3596_v15 = vld [vmem:[#allocation6 + $0x304] ss:$16 sps:$4 sm:$0xff]  }
 0x28d   :  { %v3599_v16 = vld [vmem:[#allocation6 + $0x30c] ss:$16 sps:$4 sm:$0xff]   ;;  %v3594_v17 = vld [vmem:[#allocation6 + $0x300] ss:$16 sps:$4 sm:$0xff]   ;;  %v3597_v18 = vld [vmem:[#allocation6 + $0x308] ss:$16 sps:$4 sm:$0xff]  }
 0x28e   :  { %v3602_v19 = vld [vmem:[#allocation6 + $0x324] ss:$16 sps:$4 sm:$0xff]   ;;  %v3605_v20 = vld [vmem:[#allocation6 + $0x32c] ss:$16 sps:$4 sm:$0xff]   ;;  %v3600_v22 = vld [vmem:[#allocation6 + $0x320] ss:$16 sps:$4 sm:$0xff]  }
 0x28f   :  { %v3611_v25 = vld [vmem:[#allocation6 + $0x34c] ss:$16 sps:$4 sm:$0xff]   ;;  %v3606_v27 = vld [vmem:[#allocation6 + $0x340] ss:$16 sps:$4 sm:$0xff]  }
 0x290   :  { %v3649_v57 = vld [vmem:[#allocation7 + $0x88] sm:$0xff]  }
 0x292   :  { %v3697_v21 = vpop.eup %3696 }
 0x293   :  { %v1409_v23 = vmul.f32 0.6931472, %v3697_v21  ;;  %v3699_v26 = vpop.eup %3698 }
 0x294   :  { %v1418_v29 = vmul.f32 0.6931472, %v3699_v26  ;;  %v3701_v31 = vpop.eup %3700 }
 0x295   :  { %v1415_v28 = vsel %vm1414_vm8, %v1412_v24, %v1409_v23  ;;  %v1436_v34 = vmul.f32 0.6931472, %v3701_v31  ;;  %v3703_v21 = vpop.eup %3702  ;;  %v3603_v23 = vld [vmem:[#allocation6 + $0x328] ss:$16 sps:$4 sm:$0xff]   ;;  %v3608_v24 = vld [vmem:[#allocation6 + $0x344] ss:$16 sps:$4 sm:$0xff]  }
 0x296   :  { %v1443_v32 = vsel %vm1395_vm9, %v3177_v53, %v1415_v28  ;;  %v1424_v33 = vsel %vm1423_vm11, %v1421_v30, %v1418_v29  ;;  %v3567_v53 = vld [vmem:[#allocation6 + $0x268] ss:$16 sps:$4 sm:$0xff]   ;;  %v1425_v26 = vadd.f32 1.0, %v3703_v21  ;;  %v3614_v29 = vld [vmem:[#allocation6 + $0x364] ss:$16 sps:$4 sm:$0xff]  }
 0x297   :  { %v1444_v41 = vsel %vm1396_vm10, %v3178_v0, %v1424_v33  ;;  %v1442_v45 = vsel %vm1441_vm12, %v1439_v36, %v1436_v34  ;;  %v1447_v46 = vpack.c.bf16 %v1443_v32, %v1443_v32  ;;  %v3575_v0 = vld [vmem:[#allocation6 + $0x28c] ss:$16 sps:$4 sm:$0xff]   ;;  %v3609_v28 = vld [vmem:[#allocation6 + $0x348] ss:$16 sps:$4 sm:$0xff]   ;;  %v3612_v31 = vld [vmem:[#allocation6 + $0x360] ss:$16 sps:$4 sm:$0xff]  }
 0x298   :  { %v1448_v42 = vpack.c.bf16 %v1444_v41, %v1444_v41  ;;  %v1446_v47 = vsel %vm1398_vm13, %v3180_v1, %v1442_v45  ;;  %v3570_v1 = vld [vmem:[#allocation6 + $0x280] ss:$16 sps:$4 sm:$0xff]   ;;  %v3617_v30 = vld [vmem:[#allocation6 + $0x36c] ss:$16 sps:$4 sm:$0xff]   ;;  %3704 = vlog2.f32 %v1425_v26  ;;  %v3615_v32 = vld [vmem:[#allocation6 + $0x368] ss:$16 sps:$4 sm:$0xff]  }
 0x299   :  { %v1450_v49 = vpack.c.bf16 %v1446_v47, %v1446_v47  ;;  %v3620_v33 = vld [vmem:[#allocation6 + $0x384] ss:$16 sps:$4 sm:$0xff]   ;;  %v3623_v34 = vld [vmem:[#allocation6 + $0x38c] ss:$16 sps:$4 sm:$0xff]   ;;  %v3618_v36 = vld [vmem:[#allocation6 + $0x380] ss:$16 sps:$4 sm:$0xff]  }
 0x29a   :  { %2273 = vmatprep.mubr.bf16.mxu0 %v1448_v42  ;;  %2355 = vmatprep.mubr.bf16.mxu1 %v1448_v42  ;;  %v3621_v41 = vld [vmem:[#allocation6 + $0x388] ss:$16 sps:$4 sm:$0xff]   ;;  %v1428_v42 = vmul.f32 -0.5, %v3703_v21 }
 0x29b   :  { %2274 = vmatmul.mubr.bf16.vlgmr.msra.gmra.mrb[8].mxu0 %v1447_v46  ;;  %2356 = vmatmul.mubr.bf16.vlgmr.msra.gmra.mrb[8].mxu1 %v1447_v46  ;;  %v3624_v46 = vld [vmem:[#allocation6 + $0x3a0] ss:$16 sps:$4 sm:$0xff]   ;;  %v3627_v47 = vld [vmem:[#allocation6 + $0x3a8] ss:$16 sps:$4 sm:$0xff]  }
 0x29c   :  { %2283 = vmatpush1.bf16.msra.mxu0 %v3546_v43  ;;  %2365 = vmatpush1.bf16.msra.mxu1 %v3549_v44  ;;  %v3626_v43 = vld [vmem:[#allocation6 + $0x3a4] ss:$16 sps:$4 sm:$0xff]   ;;  %v3629_v44 = vld [vmem:[#allocation6 + $0x3ac] ss:$16 sps:$4 sm:$0xff]  }
 0x29d   :  { %2314 = vmatprep.mubr.bf16.mxu0 %v1450_v49  ;;  %2396 = vmatprep.mubr.bf16.mxu1 %v1450_v49  ;;  %v3635_v49 = vld [vmem:[#allocation6 + $0x3cc] ss:$16 sps:$4 sm:$0xff]  }
 0x29e   :  { %2284 = vmatprep.subr.bf16.mxu0 %v3554_v48  ;;  %2366 = vmatprep.subr.bf16.mxu1 %v3557_v37  ;;  %v1429_v48 = vadd.f32 1.0, %v1428_v42  ;;  %v3632_v37 = vld [vmem:[#allocation6 + $0x3c4] ss:$16 sps:$4 sm:$0xff]   ;;  %v3670_v26 = vld [vmem:[#allocation7 + $0x78] sm:$0xff]  }
 0x2a0   :  { %2285 = vmatpush1.bf16.msra.mxu0 %v3552_v50  ;;  %2367 = vmatpush1.bf16.msra.mxu1 %v3555_v54  ;;  %v1431_v50 = vand.u32 2147483647, %v3703_v21 }
 0x2a1   :  { %2286 = vmatprep.subr.bf16.mxu0 %v3560_v55  ;;  %2368 = vmatprep.subr.bf16.mxu1 %v3563_v39  ;;  %v3630_v55 = vld [vmem:[#allocation6 + $0x3c0] ss:$16 sps:$4 sm:$0xff]   ;;  %v3633_v39 = vld [vmem:[#allocation6 + $0x3c8] ss:$16 sps:$4 sm:$0xff]  }
 0x2a2   :  { %v3705_v45 = vpop.eup %3704  ;;  %vm1432_vm14 = vcmp.lt.f32.partialorder %v1431_v50, 0.0004427343 }
 0x2a3   :  { %v1427_v54 = vmul.f32 0.6931472, %v3705_v45 }
 0x2a4   :  { %2287 = vmatpush1.bf16.msra.mxu0 %v3558_v56  ;;  %2369 = vmatpush1.bf16.msra.mxu1 %v3561_v58  ;;  %v1430_v56 = vmul.f32 %v3703_v21, %v1429_v48  ;;  %v3638_v58 = vld [vmem:[#allocation6 + $0x3e4] ss:$16 sps:$4 sm:$0xff]   ;;  %v3665_v21 = vld [vmem:[#allocation7 + $0xa8] sm:$0xff]  }
 0x2a5   :  { %2288 = vmatprep.subr.bf16.mxu0 %v3566_v59  ;;  %2370 = vmatprep.subr.bf16.mxu1 %v3569_v60  ;;  %v3641_v59 = vld [vmem:[#allocation6 + $0x3ec] ss:$16 sps:$4 sm:$0xff]  }
 0x2a6   :  { %v1433_v60 = vsel %vm1432_vm14, %v1430_v56, %v1427_v54 }
 0x2a7   :  { %v1445_v62 = vsel %vm1397_vm15, %v4011_v3, %v1433_v60  ;;  %v3650_v3 = vld [vmem:[#allocation7 + $0x50] sm:$0xff]  }
 0x2a8   :  { %2289 = vmatpush1.bf16.msra.mxu0 %v3564_v52  ;;  %2371 = vmatpush1.bf16.msra.mxu1 %v3567_v53  ;;  %v3636_v52 = vld [vmem:[#allocation6 + $0x3e0] ss:$16 sps:$4 sm:$0xff]   ;;  %v3639_v53 = vld [vmem:[#allocation6 + $0x3e8] ss:$16 sps:$4 sm:$0xff]  }
 0x2a9   :  { %2290 = vmatprep.subr.bf16.mxu0 %v3572_v63  ;;  %2372 = vmatprep.subr.bf16.mxu1 %v3575_v0  ;;  %v1449_v63 = vpack.c.bf16 %v1445_v62, %v1445_v62  ;;  %v3642_v0 = vld [vmem:[#allocation7 + $0x40] sm:$0xff]  }
 0x2ac   :  { %2291 = vmatpush1.bf16.msra.mxu0 %v3570_v1  ;;  %2373 = vmatpush1.bf16.msra.mxu1 %v3573_v2  ;;  %v3643_v1 = vld [vmem:[#allocation7 + $0xc0] sm:$0xff]  }
 0x2ad   :  { %2292 = vmatprep.subr.bf16.mxu0 %v3578_v4  ;;  %2374 = vmatprep.subr.bf16.mxu1 %v3581_v5  ;;  %v3644_v2 = vld [vmem:[#allocation7] sm:$0xff]   ;;  %v3646_v5 = vld [vmem:[#allocation7 + $0x48] sm:$0xff]  }
 0x2ae   :  { %v3645_v4 = vld [vmem:[#allocation7 + $0x80] sm:$0xff]  }
 0x2b0   :  { %2293 = vmatpush1.bf16.msra.mxu0 %v3576_v6  ;;  %2375 = vmatpush1.bf16.msra.mxu1 %v3579_v7  ;;  %v3647_v6 = vld [vmem:[#allocation7 + $0xc8] sm:$0xff]  }
 0x2b1   :  { %2294 = vmatprep.subr.bf16.mxu0 %v3584_v8  ;;  %2376 = vmatprep.subr.bf16.mxu1 %v3587_v9  ;;  %v3648_v7 = vld [vmem:[#allocation7 + $0x8] sm:$0xff]   ;;  %v3651_v8 = vld [vmem:[#allocation7 + $0xd0] sm:$0xff]  }
 0x2b2   :  { %v3652_v9 = vld [vmem:[#allocation7 + $0x10] sm:$0xff]  }
 0x2b4   :  { %2295 = vmatpush1.bf16.msra.mxu0 %v3582_v10  ;;  %2377 = vmatpush1.bf16.msra.mxu1 %v3585_v11  ;;  %v3653_v10 = vld [vmem:[#allocation7 + $0x90] sm:$0xff]   ;;  %v3654_v11 = vld [vmem:[#allocation7 + $0x58] sm:$0xff]  }
 0x2b5   :  { %2296 = vmatprep.subr.bf16.mxu0 %v3590_v61  ;;  %2378 = vmatprep.subr.bf16.mxu1 %v3593_v12  ;;  %v3655_v61 = vld [vmem:[#allocation7 + $0xd8] sm:$0xff]  }
 0x2b6   :  { %v3656_v12 = vld [vmem:[#allocation7 + $0x18] sm:$0xff]  }
 0x2b8   :  { %2297 = vmatpush1.bf16.msra.mxu0 %v3588_v13  ;;  %2379 = vmatpush1.bf16.msra.mxu1 %v3591_v14  ;;  %v3657_v13 = vld [vmem:[#allocation7 + $0x98] sm:$0xff]   ;;  %v3658_v14 = vld [vmem:[#allocation7 + $0x60] sm:$0xff]  }
 0x2b9   :  { %2298 = vmatprep.subr.bf16.mxu0 %v3596_v15  ;;  %2380 = vmatprep.subr.bf16.mxu1 %v3599_v16  ;;  %v3659_v15 = vld [vmem:[#allocation7 + $0xe0] sm:$0xff]  }
 0x2ba   :  { %v3660_v16 = vld [vmem:[#allocation7 + $0x20] sm:$0xff]  }
 0x2bc   :  { %2299 = vmatpush1.bf16.msra.mxu0 %v3594_v17  ;;  %2381 = vmatpush1.bf16.msra.mxu1 %v3597_v18  ;;  %v3661_v17 = vld [vmem:[#allocation7 + $0xa0] sm:$0xff]   ;;  %v3662_v18 = vld [vmem:[#allocation7 + $0x68] sm:$0xff]  }
 0x2bd   :  { %2300 = vmatprep.subr.bf16.mxu0 %v3602_v19  ;;  %2382 = vmatprep.subr.bf16.mxu1 %v3605_v20  ;;  %v3663_v19 = vld [vmem:[#allocation7 + $0xe8] sm:$0xff]  }
 0x2be   :  { %v3664_v20 = vld [vmem:[#allocation7 + $0x28] sm:$0xff]  }
 0x2c0   :  { %2301 = vmatpush1.bf16.msra.mxu0 %v3600_v22  ;;  %2383 = vmatpush1.bf16.msra.mxu1 %v3603_v23  ;;  %v3666_v22 = vld [vmem:[#allocation7 + $0x70] sm:$0xff]  }
 0x2c1   :  { %2302 = vmatprep.subr.bf16.mxu0 %v3608_v24  ;;  %2384 = vmatprep.subr.bf16.mxu1 %v3611_v25  ;;  %v3667_v23 = vld [vmem:[#allocation7 + $0xf0] sm:$0xff]  }
 0x2c2   :  { %v3668_v24 = vld [vmem:[#allocation7 + $0x30] sm:$0xff]  }
 0x2c3   :  { %v3669_v25 = vld [vmem:[#allocation7 + $0xb0] sm:$0xff]  }
 0x2c4   :  { %2303 = vmatpush1.bf16.msra.mxu0 %v3606_v27  ;;  %2385 = vmatpush1.bf16.msra.mxu1 %v3609_v28  ;;  %v3671_v27 = vld [vmem:[#allocation7 + $0xf8] sm:$0xff]  }
 0x2c5   :  { %2304 = vmatprep.subr.bf16.mxu0 %v3614_v29  ;;  %2386 = vmatprep.subr.bf16.mxu1 %v3617_v30  ;;  %v3672_v28 = vld [vmem:[#allocation7 + $0x38] sm:$0xff]   ;;  %v1579_v30 = vld [vmem:[%s4051_s6] sm:$0xf] }
 0x2c6   :  { %v3673_v29 = vld [vmem:[#allocation7 + $0xb8] sm:$0xff]  }
 0x2c8   :  { %2305 = vmatpush1.bf16.msra.mxu0 %v3612_v31  ;;  %2387 = vmatpush1.bf16.msra.mxu1 %v3615_v32  ;;  %v1584_v31 = vrot.slane %v1579_v30, %v3952_v38  ;;  %v1592_v32 = vrot.slane %v1579_v30, %v3978_v35 }
 0x2c9   :  { %2306 = vmatprep.subr.bf16.mxu0 %v3620_v33  ;;  %2388 = vmatprep.subr.bf16.mxu1 %v3623_v34  ;;  %v1588_v33 = vrot.slane %v1579_v30, %v3960_v40  ;;  %v1596_v34 = vrot.slane %v1579_v30, %v3967_v51 }
 0x2cc   :  { %2307 = vmatpush1.bf16.msra.mxu0 %v3618_v36  ;;  %2389 = vmatpush1.bf16.msra.mxu1 %v3621_v41 }
 0x2cd   :  { %2308 = vmatprep.subr.bf16.mxu0 %v3626_v43  ;;  %2390 = vmatprep.subr.bf16.mxu1 %v3629_v44 }
 0x2d0   :  { %2309 = vmatpush1.bf16.msra.mxu0 %v3624_v46  ;;  %2391 = vmatpush1.bf16.msra.mxu1 %v3627_v47 }
 0x2d1   :  { %2310 = vmatprep.subr.bf16.mxu0 %v3632_v37  ;;  %2392 = vmatprep.subr.bf16.mxu1 %v3635_v49 }
 0x2d4   :  { %2311 = vmatpush1.bf16.msra.mxu0 %v3630_v55  ;;  %2393 = vmatpush1.bf16.msra.mxu1 %v3633_v39 }
 0x2d5   :  { %2312 = vmatprep.subr.bf16.mxu0 %v3638_v58  ;;  %2394 = vmatprep.subr.bf16.mxu1 %v3641_v59 }
 0x2d8   :  { %2313 = vmatpush1.bf16.msra.mxu0 %v3636_v52  ;;  %2395 = vmatpush1.bf16.msra.mxu1 %v3639_v53 }
 0x2d9   :  { %3133 = vmatprep.subr.bf16.mxu0 %v3642_v0  ;;  %3155 = vmatprep.subr.bf16.mxu1 %v3643_v1 }
 0x2db   :  { %2315 = vmatmul.mubr.bf16.vlgmr.msra.gmra.mrb[8].mxu0 %v1449_v63  ;;  %2397 = vmatmul.mubr.bf16.vlgmr.msra.gmra.mrb[8].mxu1 %v1449_v63 }
 0x2dc   :  { %3134 = vmatpush3.bf16.msra.mxu0 %v3644_v2  ;;  %3156 = vmatpush3.bf16.msra.mxu1 %v3645_v4 }
 0x2dd   :  { %3135 = vmatprep.subr.bf16.mxu0 %v3646_v5  ;;  %3157 = vmatprep.subr.bf16.mxu1 %v3647_v6 }
 0x2e0   :  { %3136 = vmatpush3.bf16.msra.mxu0 %v3648_v7  ;;  %3158 = vmatpush3.bf16.msra.mxu1 %v3649_v57 }
 0x2e1   :  { %3137 = vmatprep.subr.bf16.mxu0 %v3650_v3  ;;  %3159 = vmatprep.subr.bf16.mxu1 %v3651_v8 }
 0x2e4   :  { %3138 = vmatpush3.bf16.msra.mxu0 %v3652_v9  ;;  %3160 = vmatpush3.bf16.msra.mxu1 %v3653_v10 }
 0x2e5   :  { %3139 = vmatprep.subr.bf16.mxu0 %v3654_v11  ;;  %3161 = vmatprep.subr.bf16.mxu1 %v3655_v61 }
 0x2e8   :  { %3140 = vmatpush3.bf16.msra.mxu0 %v3656_v12  ;;  %3162 = vmatpush3.bf16.msra.mxu1 %v3657_v13 }
 0x2e9   :  { %3141 = vmatprep.subr.bf16.mxu0 %v3658_v14  ;;  %3163 = vmatprep.subr.bf16.mxu1 %v3659_v15 }
 0x2ec   :  { %3142 = vmatpush3.bf16.msra.mxu0 %v3660_v16  ;;  %3164 = vmatpush3.bf16.msra.mxu1 %v3661_v17 }
 0x2ed   :  { %3143 = vmatprep.subr.bf16.mxu0 %v3662_v18  ;;  %3165 = vmatprep.subr.bf16.mxu1 %v3663_v19 }
 0x2f0   :  { %3144 = vmatpush3.bf16.msra.mxu0 %v3664_v20  ;;  %3166 = vmatpush3.bf16.msra.mxu1 %v3665_v21 }
 0x2f1   :  { %3145 = vmatprep.subr.bf16.mxu0 %v3666_v22  ;;  %3167 = vmatprep.subr.bf16.mxu1 %v3667_v23 }
 0x2f4   :  { %3146 = vmatpush3.bf16.msra.mxu0 %v3668_v24  ;;  %3168 = vmatpush3.bf16.msra.mxu1 %v3669_v25 }
 0x2f5   :  { %3147 = vmatprep.subr.bf16.mxu0 %v3670_v26  ;;  %3169 = vmatprep.subr.bf16.mxu1 %v3671_v27 }
 0x2f8   :  { %3148 = vmatpush3.bf16.msra.mxu0 %v3672_v28  ;;  %3170 = vmatpush3.bf16.msra.mxu1 %v3673_v29 }
 0x3ae   :  { %v2316_v36 = vpop.f32.mrb[8].mxu0  ;;  %v2398_v41 = vpop.f32.mrb[8].mxu1 }
 0x3af   :  { %v3181_v42 = vadd.f32 %v2316_v36, %v1584_v31  ;;  %v4023_v43 = vadd.f32 %v2398_v41, %v1592_v32  ;;  %v2318_v44 = vpop.f32.mrb[9].mxu0  ;;  %v2400_v45 = vpop.f32.mrb[9].mxu1 }
 0x3b0   :  { %v3182_v46 = vadd.f32 %v2318_v44, %v1588_v33  ;;  %v4025_v47 = vadd.f32 %v2400_v45, %v1596_v34  ;;  %v2320_v48 = vpop.f32.mrb[10].mxu0  ;;  %v2402_v37 = vpop.f32.mrb[10].mxu1  ;;  %v3100_v33 = vld [vmem:[%s4053_s8] ss:$0 sm:$0xff] }
 0x3b1   :  { %v2409_v49 = vmul.f32 1.442695, %v3181_v42  ;;  %v2413_v38 = vmul.f32 1.442695, %v4023_v43  ;;  %v2321_v51 = vpop.f32.mrb[11].mxu0  ;;  %v2403_v50 = vpop.f32.mrb[11].mxu1 }
 0x3b2   :  { %v2411_v35 = vmul.f32 1.442695, %v3182_v46  ;;  %v2415_v40 = vmul.f32 1.442695, %v4025_v47  ;;  %vm2405_vm2 = vcmp.gt.f32.partialorder %v3181_v42, 20.0  ;;  %vm2406_vm3 = vcmp.gt.f32.partialorder %v3182_v46, 20.0 }
 0x3b3   :  { %3706 = vpow2.f32 %v2409_v49  ;;  %vm2407_vm5 = vcmp.gt.f32.partialorder %v4023_v43, 20.0  ;;  %vm2408_vm7 = vcmp.gt.f32.partialorder %v4025_v47, 20.0 }
 0x3b4   :  { %3708 = vpow2.f32 %v2413_v38 }
 0x3b5   :  { %3710 = vpow2.f32 %v2411_v35 }
 0x3b6   :  { %3712 = vpow2.f32 %v2415_v40 }
 0x3bd   :  { %v3707_v54 = vpop.eup %3706 }
 0x3be   :  { %v3709_v55 = vpop.eup %3708  ;;  %v2417_v39 = vadd.f32 1.0, %v3707_v54  ;;  %v2420_v53 = vmul.f32 -0.5, %v3707_v54  ;;  %v2423_v2 = vand.u32 2147483647, %v3707_v54 }
 0x3bf   :  { %v3711_v56 = vpop.eup %3710  ;;  %v2435_v58 = vadd.f32 1.0, %v3709_v55  ;;  %v2438_v62 = vmul.f32 -0.5, %v3709_v55  ;;  %v2441_v5 = vand.u32 2147483647, %v3709_v55 }
 0x3c0   :  { %v3713_v59 = vpop.eup %3712  ;;  %3714 = vlog2.f32 %v2417_v39  ;;  %v2426_v60 = vadd.f32 1.0, %v3711_v56  ;;  %v2429_v63 = vmul.f32 -0.5, %v3711_v56  ;;  %v2421_v0 = vadd.f32 1.0, %v2420_v53 }
 0x3c1   :  { %3716 = vlog2.f32 %v2435_v58  ;;  %v2444_v52 = vadd.f32 1.0, %v3713_v59  ;;  %v2447_v1 = vmul.f32 -0.5, %v3713_v59  ;;  %v2439_v4 = vadd.f32 1.0, %v2438_v62 }
 0x3c2   :  { %3718 = vlog2.f32 %v2426_v60  ;;  %v2430_v6 = vadd.f32 1.0, %v2429_v63  ;;  %v2432_v57 = vand.u32 2147483647, %v3711_v56  ;;  %v2422_v9 = vmul.f32 %v3707_v54, %v2421_v0 }
 0x3c3   :  { %3720 = vlog2.f32 %v2444_v52  ;;  %v2448_v10 = vadd.f32 1.0, %v2447_v1  ;;  %vm2424_vm0 = vcmp.lt.f32.partialorder %v2423_v2, 0.0004427343  ;;  %v2440_v12 = vmul.f32 %v3709_v55, %v2439_v4 }
 0x3c4   :  { %v2450_v13 = vand.u32 2147483647, %v3713_v59  ;;  %vm4029_vm1 = vcmp.lt.f32.partialorder %v2441_v5, 0.0004427343  ;;  %v2431_v17 = vmul.f32 %v3711_v56, %v2430_v6  ;;  %vm2433_vm4 = vcmp.lt.f32.partialorder %v2432_v57, 0.0004427343 }
 0x3c5   :  { %v2449_v23 = vmul.f32 %v3713_v59, %v2448_v10 }
 0x3c6   :  { %vm2451_vm6 = vcmp.lt.f32.partialorder %v2450_v13, 0.0004427343 }
 0x3ca   :  { %v3715_v7 = vpop.eup %3714 }
 0x3cb   :  { %v3717_v3 = vpop.eup %3716  ;;  %v2419_v8 = vmul.f32 0.6931472, %v3715_v7 }
 0x3cc   :  { %v3719_v11 = vpop.eup %3718  ;;  %v2437_v61 = vmul.f32 0.6931472, %v3717_v3 }
 0x3cd   :  { %v2425_v14 = vsel %vm2424_vm0, %v2422_v9, %v2419_v8  ;;  %v2428_v16 = vmul.f32 0.6931472, %v3719_v11  ;;  %v3721_v18 = vpop.eup %3720 }
 0x3ce   :  { %v2443_v19 = vsel %vm4029_vm1, %v2440_v12, %v2437_v61  ;;  %v2453_v20 = vsel %vm2405_vm2, %v3181_v42, %v2425_v14  ;;  %v2446_v22 = vmul.f32 0.6931472, %v3721_v18 }
 0x3cf   :  { %v2434_v21 = vsel %vm2433_vm4, %v2431_v17, %v2428_v16  ;;  %v2455_v25 = vsel %vm2407_vm5, %v4023_v43, %v2443_v19  ;;  %v2457_v28 = vpack.c.bf16 %v2453_v20, %v2453_v20 }
 0x3d0   :  { %v2454_v24 = vsel %vm2406_vm3, %v3182_v46, %v2434_v21  ;;  %v2452_v27 = vsel %vm2451_vm6, %v2449_v23, %v2446_v22  ;;  %v2459_v31 = vpack.c.bf16 %v2455_v25, %v2455_v25 }
 0x3d1   :  { %v2458_v26 = vpack.c.bf16 %v2454_v24, %v2454_v24  ;;  %v2456_v29 = vsel %vm2408_vm7, %v4025_v47, %v2452_v27 }
 0x3d2   :  { %v2460_v30 = vpack.c.bf16 %v2456_v29, %v2456_v29 }
 0x3d3   :  { %2756 = vmatprep.mubr.bf16.mxu0 %v2458_v26 }
 0x3d4   :  { %2757 = vmatmul.mubr.bf16.vlgmr.msra.gmra.mrb[12].mxu0 %v2457_v28  ;;  %2796 = vmatprep.mubr.bf16.mxu1 %v2460_v30 }
 0x3d5   :  { %2797 = vmatmul.mubr.bf16.vlgmr.msra.gmra.mrb[12].mxu1 %v2459_v31 }
 0x4a7   :  { %v3149_v32 = vpop.f32.mrb[12].mxu0 }
 0x4a8   :  { %v3150_v34 = vpop.f32.mrb[13].mxu0  ;;  %v3171_v36 = vpop.f32.mrb[12].mxu1 }
 0x4a9   :  { %v3151_v41 = vadd.f32 %v3150_v34, %v3149_v32  ;;  %v3152_v42 = vpop.f32.mrb[14].mxu0  ;;  %v3172_v43 = vpop.f32.mrb[13].mxu1 }
 0x4aa   :  { %v3153_v44 = vpop.f32.mrb[15].mxu0  ;;  %v3173_v46 = vadd.f32 %v3172_v43, %v3171_v36  ;;  %v3174_v47 = vpop.f32.mrb[14].mxu1 }
 0x4ab   :  { %v2759_v45 = vadd.f32 %v3151_v41, %v3100_v33  ;;  %v3175_v48 = vpop.f32.mrb[15].mxu1 }
 0x4ad   :  { %v2799_v37 = vadd.f32 %v3173_v46, %v2759_v45 }
 0x4af   :  { %2804 = vst [vmem:[%s4054_s9] sm:$0xff] %v2799_v37 }
 0x4b0   :  { %2809 = vsyncpa [#allocation3], 1 }
 0x4b1   :  { %2810 = vsyncpa [#allocation5], 1 }
 0x4b2   :  { %2811 = vsyncpa [#allocation8], 1 }

</bundles_post_ra>
